<compile_context>
chip_gen: v5e
topology: v5e:2x2
jax: 0.10.0
libtpu: 0.0.40
codegen_flags: <defaults>
</compile_context>

<pallas_src>
import numpy as np
import jax
import jax.numpy as jnp
from jax.experimental import pallas as pl
from jax.experimental.pallas import tpu as pltpu

HIDDEN = 20          # U: Linear(2,20) -> 7x Linear(20,20) -> Linear(20,1)
N_LAYERS = 7
NU = 0.01 / np.pi    # viscosity coefficient in F


def burgers_residual_kernel(inp_ref, w_in_ref, b_in_ref, w_h_ref, b_h_ref,
                            w_out_ref, b_out_ref, out_ref):
    """Feature-major forward-mode propagation of (u, u_x, u_t, u_xx).

    inp_ref   : (2, NB)                 rows = [x; t], points on lanes
    w_in_ref  : (HIDDEN, 2)             PyTorch (out, in) layout
    b_in_ref  : (HIDDEN, 1)
    w_h_ref   : (N_LAYERS, HIDDEN, HIDDEN)
    b_h_ref   : (N_LAYERS, HIDDEN, 1)
    w_out_ref : (1, HIDDEN)
    b_out_ref : (1, 1)
    out_ref   : (1, NB)                 Burgers residual, lane-dense
    """
    xt = inp_ref[...]                                   # (2, NB)
    nb = xt.shape[1]

    # ---- layer 0 (Linear(2,20) + tanh), specialized tangent seeds -----------
    w_in = w_in_ref[...]                                # (HIDDEN, 2)
    z = jnp.dot(w_in, xt, preferred_element_type=jnp.float32) + b_in_ref[...]
    # d(input)/dx = e0, d(input)/dt = e1, d2(input)/dx2 = 0  =>
    # z_x = w_in[:, 0] (broadcast over points), z_t = w_in[:, 1], z_xx = 0.
    z_x = jnp.broadcast_to(w_in[:, 0:1], (HIDDEN, nb))
    z_t = jnp.broadcast_to(w_in[:, 1:2], (HIDDEN, nb))
    a = jnp.tanh(z)
    s = 1.0 - a * a                                     # tanh'(z)
    h = a
    h_x = s * z_x
    h_t = s * z_t
    h_xx = -2.0 * a * s * z_x * z_x                     # tanh''(z) * z_x^2

    # ---- 7 hidden Linear(20,20) + tanh: one stacked matmul per layer --------
    for i in range(N_LAYERS):
        W = w_h_ref[i]                                  # (HIDDEN, HIDDEN)
        b = b_h_ref[i]                                  # (HIDDEN, 1)
        stacked = jnp.concatenate([h, h_x, h_t, h_xx], axis=1)   # (HIDDEN, 4*NB)
        zs = jnp.dot(W, stacked, preferred_element_type=jnp.float32)
        z = zs[:, 0 * nb:1 * nb] + b
        z_x = zs[:, 1 * nb:2 * nb]
        z_t = zs[:, 2 * nb:3 * nb]
        z_xx = zs[:, 3 * nb:4 * nb]
        a = jnp.tanh(z)
        s = 1.0 - a * a
        h = a
        h_x = s * z_x
        h_t = s * z_t
        h_xx = s * z_xx - 2.0 * a * s * z_x * z_x

    # ---- output Linear(20,1): fuse u_t - NU*u_xx before projection ----------
    W = w_out_ref[...]                                  # (1, HIDDEN)
    stacked = jnp.concatenate([h, h_x, h_t - NU * h_xx], axis=1)  # (HIDDEN, 3*NB)
    us = jnp.dot(W, stacked, preferred_element_type=jnp.float32)  # (1, 3*NB)
    u = us[:, 0 * nb:1 * nb] + b_out_ref[...]
    u_x = us[:, 1 * nb:2 * nb]
    v = us[:, 2 * nb:3 * nb]                            # = u_t - NU * u_xx

    # Burgers residual  F = u_t + u * u_x - NU * u_xx
    out_ref[...] = v + u * u_x


def burgers_residual(x, t, params, block=128):
    """x, t: (N,) float32  ->  (N, 1) float32 residual."""
    n = x.shape[0]
    n_pad = ((n + block - 1) // block) * block
    # feature-major input: (2, N) with points on the lane axis
    xt = jnp.stack([x, t], axis=0).astype(jnp.float32)
    if n_pad != n:
        xt = jnp.pad(xt, ((0, 0), (0, n_pad - n)))

    grid = (n_pad // block,)
    res = pl.pallas_call(
        burgers_residual_kernel,
        out_shape=jax.ShapeDtypeStruct((1, n_pad), jnp.float32),
        grid=grid,
        in_specs=[
            pl.BlockSpec((2, block), lambda i: (0, i)),                       # points tile
            pl.BlockSpec((HIDDEN, 2), lambda i: (0, 0)),                      # resident weights
            pl.BlockSpec((HIDDEN, 1), lambda i: (0, 0)),
            pl.BlockSpec((N_LAYERS, HIDDEN, HIDDEN), lambda i: (0, 0, 0)),
            pl.BlockSpec((N_LAYERS, HIDDEN, 1), lambda i: (0, 0, 0)),
            pl.BlockSpec((1, HIDDEN), lambda i: (0, 0)),
            pl.BlockSpec((1, 1), lambda i: (0, 0)),
        ],
        out_specs=pl.BlockSpec((1, block), lambda i: (0, i)),
        compiler_params=pltpu.CompilerParams(
            dimension_semantics=("parallel",)),
    )(xt, params["w_in"], params["b_in"], params["w_h"], params["b_h"],
      params["w_out"], params["b_out"])
    return res[0, :n][:, None]


def init_params(key):
    """Deterministic synthetic weights, PyTorch (out_features, in_features) layout."""
    ks = jax.random.split(key, 6)

    def w(k, shape, fan_in):
        return jax.random.normal(k, shape, jnp.float32) / np.sqrt(fan_in)

    return {
        "w_in":  w(ks[0], (HIDDEN, 2), 2),
        "b_in":  0.1 * jax.random.normal(ks[1], (HIDDEN, 1), jnp.float32),
        "w_h":   w(ks[2], (N_LAYERS, HIDDEN, HIDDEN), HIDDEN),
        "b_h":   0.1 * jax.random.normal(ks[3], (N_LAYERS, HIDDEN, 1), jnp.float32),
        "w_out": w(ks[4], (1, HIDDEN), HIDDEN),
        "b_out": 0.1 * jax.random.normal(ks[5], (1, 1), jnp.float32),
    }


# ---- pure-JAX reference (autodiff, mirrors torch.autograd.grad usage in F) ----
def _u_scalar(params, xi, ti):
    h = jnp.stack([xi, ti])                                  # (2,)
    h = jnp.tanh(params["w_in"] @ h + params["b_in"][:, 0])
    for i in range(N_LAYERS):
        h = jnp.tanh(params["w_h"][i] @ h + params["b_h"][i, :, 0])
    return (params["w_out"] @ h + params["b_out"][:, 0])[0]


def _reference(params, x, t):
    u = jax.vmap(lambda a, b: _u_scalar(params, a, b))(x, t)
    u_x = jax.vmap(lambda a, b: jax.grad(_u_scalar, 1)(params, a, b))(x, t)
    u_t = jax.vmap(lambda a, b: jax.grad(_u_scalar, 2)(params, a, b))(x, t)
    u_xx = jax.vmap(lambda a, b: jax.grad(jax.grad(_u_scalar, 1), 1)(params, a, b))(x, t)
    return (u_t + u * u_x - NU * u_xx)[:, None]


if __name__ == "__main__":
    key = jax.random.PRNGKey(0)
    k_params, k_x, k_t = jax.random.split(key, 3)

    N = 200  # collocation points (exercises the padded / multi-block path)
    params = init_params(k_params)
    x = jax.random.uniform(k_x, (N,), jnp.float32, minval=-1.0, maxval=1.0)
    t = jax.random.uniform(k_t, (N,), jnp.float32, minval=0.0, maxval=1.0)

    f_kernel = burgers_residual(x, t, params, block=128)
    jax.block_until_ready(f_kernel)

    f_ref = _reference(params, x, t)
    np.testing.assert_allclose(np.asarray(f_kernel), np.asarray(f_ref),
                               rtol=1e-4, atol=1e-4)

    print("KERNEL_OK")
</pallas_src>

<mosaic_0001>
module attributes {stable_mosaic.version = 11 : i64} {
  func.func @burgers_residual_kernel(%arg0: i32, %arg1: memref<2x128xf32, #tpu.memory_space<vmem>>, %arg2: memref<20x2xf32, #tpu.memory_space<vmem>>, %arg3: memref<20x1xf32, #tpu.memory_space<vmem>>, %arg4: memref<7x20x20xf32, #tpu.memory_space<vmem>>, %arg5: memref<7x20x1xf32, #tpu.memory_space<vmem>>, %arg6: memref<1x20xf32, #tpu.memory_space<vmem>>, %arg7: memref<1x1xf32, #tpu.memory_space<vmem>>, %arg8: memref<1x128xf32, #tpu.memory_space<vmem>>) attributes {dimension_semantics = [#tpu.dimension_semantics<parallel>], iteration_bounds = array<i64: 2>, scalar_prefetch = 0 : i64, scratch_operands = 0 : i64, tpu.core_type = #tpu.core_type<tc>, window_params = [{transform_indices = @transform_0, window_bounds = array<i64: 2, 128>}, {pipeline_mode = #tpu.pipeline_mode<synchronous>, transform_indices = @transform_1, window_bounds = array<i64: 20, 2>}, {pipeline_mode = #tpu.pipeline_mode<synchronous>, transform_indices = @transform_2, window_bounds = array<i64: 20, 1>}, {pipeline_mode = #tpu.pipeline_mode<synchronous>, transform_indices = @transform_3, window_bounds = array<i64: 7, 20, 20>}, {pipeline_mode = #tpu.pipeline_mode<synchronous>, transform_indices = @transform_4, window_bounds = array<i64: 7, 20, 1>}, {pipeline_mode = #tpu.pipeline_mode<synchronous>, transform_indices = @transform_5, window_bounds = array<i64: 1, 20>}, {pipeline_mode = #tpu.pipeline_mode<synchronous>, transform_indices = @transform_6, window_bounds = array<i64: 1, 1>}, {transform_indices = @transform_7, window_bounds = array<i64: 1, 128>}]} {
    %c0 = arith.constant 0 : index
    %c0_0 = arith.constant 0 : index
    %0 = vector.load %arg1[%c0, %c0_0] : memref<2x128xf32, #tpu.memory_space<vmem>>, vector<2x128xf32>
    %c0_1 = arith.constant 0 : index
    %c0_2 = arith.constant 0 : index
    %1 = vector.load %arg2[%c0_1, %c0_2] : memref<20x2xf32, #tpu.memory_space<vmem>>, vector<20x2xf32>
    %cst = arith.constant dense<0.000000e+00> : vector<20x128xf32>
    %2 = tpu.matmul %1, %0, %cst {dimension_numbers = #tpu.dot_dimension_numbers<[1], [0], [0], [1], [0, 0, 1, 1], [], []>} : vector<20x2xf32>, vector<2x128xf32>, vector<20x128xf32> -> vector<20x128xf32>
    %c0_3 = arith.constant 0 : index
    %c0_4 = arith.constant 0 : index
    %3 = vector.load %arg3[%c0_3, %c0_4] : memref<20x1xf32, #tpu.memory_space<vmem>>, vector<20x1xf32>
    %4 = vector.broadcast %3 : vector<20x1xf32> to vector<20x128xf32>
    %5 = arith.addf %2, %4 : vector<20x128xf32>
    %6 = vector.extract_strided_slice %1 {offsets = [0, 0], sizes = [20, 1], strides = [1, 1]} : vector<20x2xf32> to vector<20x1xf32>
    %7 = vector.shape_cast %6 : vector<20x1xf32> to vector<20x1xf32>
    %8 = vector.broadcast %7 : vector<20x1xf32> to vector<20x128xf32>
    %9 = vector.extract_strided_slice %1 {offsets = [0, 1], sizes = [20, 1], strides = [1, 1]} : vector<20x2xf32> to vector<20x1xf32>
    %10 = vector.shape_cast %9 : vector<20x1xf32> to vector<20x1xf32>
    %11 = vector.broadcast %10 : vector<20x1xf32> to vector<20x128xf32>
    %12 = math.tanh %5 : vector<20x128xf32>
    %13 = arith.mulf %12, %12 : vector<20x128xf32>
    %cst_5 = arith.constant 1.000000e+00 : f32
    %14 = vector.broadcast %cst_5 : f32 to vector<20x128xf32>
    %15 = arith.subf %14, %13 : vector<20x128xf32>
    %16 = arith.mulf %15, %8 : vector<20x128xf32>
    %17 = arith.mulf %15, %11 : vector<20x128xf32>
    %cst_6 = arith.constant -2.000000e+00 : f32
    %18 = vector.broadcast %cst_6 : f32 to vector<20x128xf32>
    %19 = arith.mulf %18, %12 : vector<20x128xf32>
    %20 = arith.mulf %19, %15 : vector<20x128xf32>
    %21 = arith.mulf %20, %8 : vector<20x128xf32>
    %22 = arith.mulf %21, %8 : vector<20x128xf32>
    %c0_7 = arith.constant 0 : index
    %c0_8 = arith.constant 0 : index
    %c0_9 = arith.constant 0 : index
    %23 = vector.load %arg4[%c0_7, %c0_8, %c0_9] : memref<7x20x20xf32, #tpu.memory_space<vmem>>, vector<1x20x20xf32>
    %24 = vector.shape_cast %23 : vector<1x20x20xf32> to vector<20x20xf32>
    %c0_10 = arith.constant 0 : index
    %c0_11 = arith.constant 0 : index
    %c0_12 = arith.constant 0 : index
    %25 = vector.load %arg5[%c0_10, %c0_11, %c0_12] : memref<7x20x1xf32, #tpu.memory_space<vmem>>, vector<1x20x1xf32>
    %26 = vector.shape_cast %25 : vector<1x20x1xf32> to vector<20x1xf32>
    %27 = tpu.concatenate %12, %16, %17, %22 in 1 : vector<20x128xf32>, vector<20x128xf32>, vector<20x128xf32>, vector<20x128xf32> -> vector<20x512xf32>
    %cst_13 = arith.constant dense<0.000000e+00> : vector<20x512xf32>
    %28 = tpu.matmul %24, %27, %cst_13 {dimension_numbers = #tpu.dot_dimension_numbers<[1], [0], [0], [1], [0, 0, 1, 1], [], []>} : vector<20x20xf32>, vector<20x512xf32>, vector<20x512xf32> -> vector<20x512xf32>
    %29 = vector.extract_strided_slice %28 {offsets = [0, 0], sizes = [20, 128], strides = [1, 1]} : vector<20x512xf32> to vector<20x128xf32>
    %30 = vector.broadcast %26 : vector<20x1xf32> to vector<20x128xf32>
    %31 = arith.addf %29, %30 : vector<20x128xf32>
    %32 = vector.extract_strided_slice %28 {offsets = [0, 128], sizes = [20, 128], strides = [1, 1]} : vector<20x512xf32> to vector<20x128xf32>
    %33 = vector.extract_strided_slice %28 {offsets = [0, 256], sizes = [20, 128], strides = [1, 1]} : vector<20x512xf32> to vector<20x128xf32>
    %34 = vector.extract_strided_slice %28 {offsets = [0, 384], sizes = [20, 128], strides = [1, 1]} : vector<20x512xf32> to vector<20x128xf32>
    %35 = math.tanh %31 : vector<20x128xf32>
    %36 = arith.mulf %35, %35 : vector<20x128xf32>
    %cst_14 = arith.constant 1.000000e+00 : f32
    %37 = vector.broadcast %cst_14 : f32 to vector<20x128xf32>
    %38 = arith.subf %37, %36 : vector<20x128xf32>
    %39 = arith.mulf %38, %32 : vector<20x128xf32>
    %40 = arith.mulf %38, %33 : vector<20x128xf32>
    %41 = arith.mulf %38, %34 : vector<20x128xf32>
    %cst_15 = arith.constant 2.000000e+00 : f32
    %42 = vector.broadcast %cst_15 : f32 to vector<20x128xf32>
    %43 = arith.mulf %42, %35 : vector<20x128xf32>
    %44 = arith.mulf %43, %38 : vector<20x128xf32>
    %45 = arith.mulf %44, %32 : vector<20x128xf32>
    %46 = arith.mulf %45, %32 : vector<20x128xf32>
    %47 = arith.subf %41, %46 : vector<20x128xf32>
    %c1 = arith.constant 1 : index
    %c0_16 = arith.constant 0 : index
    %c0_17 = arith.constant 0 : index
    %48 = vector.load %arg4[%c1, %c0_16, %c0_17] : memref<7x20x20xf32, #tpu.memory_space<vmem>>, vector<1x20x20xf32>
    %49 = vector.shape_cast %48 : vector<1x20x20xf32> to vector<20x20xf32>
    %c1_18 = arith.constant 1 : index
    %c0_19 = arith.constant 0 : index
    %c0_20 = arith.constant 0 : index
    %50 = vector.load %arg5[%c1_18, %c0_19, %c0_20] : memref<7x20x1xf32, #tpu.memory_space<vmem>>, vector<1x20x1xf32>
    %51 = vector.shape_cast %50 : vector<1x20x1xf32> to vector<20x1xf32>
    %52 = tpu.concatenate %35, %39, %40, %47 in 1 : vector<20x128xf32>, vector<20x128xf32>, vector<20x128xf32>, vector<20x128xf32> -> vector<20x512xf32>
    %cst_21 = arith.constant dense<0.000000e+00> : vector<20x512xf32>
    %53 = tpu.matmul %49, %52, %cst_21 {dimension_numbers = #tpu.dot_dimension_numbers<[1], [0], [0], [1], [0, 0, 1, 1], [], []>} : vector<20x20xf32>, vector<20x512xf32>, vector<20x512xf32> -> vector<20x512xf32>
    %54 = vector.extract_strided_slice %53 {offsets = [0, 0], sizes = [20, 128], strides = [1, 1]} : vector<20x512xf32> to vector<20x128xf32>
    %55 = vector.broadcast %51 : vector<20x1xf32> to vector<20x128xf32>
    %56 = arith.addf %54, %55 : vector<20x128xf32>
    %57 = vector.extract_strided_slice %53 {offsets = [0, 128], sizes = [20, 128], strides = [1, 1]} : vector<20x512xf32> to vector<20x128xf32>
    %58 = vector.extract_strided_slice %53 {offsets = [0, 256], sizes = [20, 128], strides = [1, 1]} : vector<20x512xf32> to vector<20x128xf32>
    %59 = vector.extract_strided_slice %53 {offsets = [0, 384], sizes = [20, 128], strides = [1, 1]} : vector<20x512xf32> to vector<20x128xf32>
    %60 = math.tanh %56 : vector<20x128xf32>
    %61 = arith.mulf %60, %60 : vector<20x128xf32>
    %cst_22 = arith.constant 1.000000e+00 : f32
    %62 = vector.broadcast %cst_22 : f32 to vector<20x128xf32>
    %63 = arith.subf %62, %61 : vector<20x128xf32>
    %64 = arith.mulf %63, %57 : vector<20x128xf32>
    %65 = arith.mulf %63, %58 : vector<20x128xf32>
    %66 = arith.mulf %63, %59 : vector<20x128xf32>
    %cst_23 = arith.constant 2.000000e+00 : f32
    %67 = vector.broadcast %cst_23 : f32 to vector<20x128xf32>
    %68 = arith.mulf %67, %60 : vector<20x128xf32>
    %69 = arith.mulf %68, %63 : vector<20x128xf32>
    %70 = arith.mulf %69, %57 : vector<20x128xf32>
    %71 = arith.mulf %70, %57 : vector<20x128xf32>
    %72 = arith.subf %66, %71 : vector<20x128xf32>
    %c2 = arith.constant 2 : index
    %c0_24 = arith.constant 0 : index
    %c0_25 = arith.constant 0 : index
    %73 = vector.load %arg4[%c2, %c0_24, %c0_25] : memref<7x20x20xf32, #tpu.memory_space<vmem>>, vector<1x20x20xf32>
    %74 = vector.shape_cast %73 : vector<1x20x20xf32> to vector<20x20xf32>
    %c2_26 = arith.constant 2 : index
    %c0_27 = arith.constant 0 : index
    %c0_28 = arith.constant 0 : index
    %75 = vector.load %arg5[%c2_26, %c0_27, %c0_28] : memref<7x20x1xf32, #tpu.memory_space<vmem>>, vector<1x20x1xf32>
    %76 = vector.shape_cast %75 : vector<1x20x1xf32> to vector<20x1xf32>
    %77 = tpu.concatenate %60, %64, %65, %72 in 1 : vector<20x128xf32>, vector<20x128xf32>, vector<20x128xf32>, vector<20x128xf32> -> vector<20x512xf32>
    %cst_29 = arith.constant dense<0.000000e+00> : vector<20x512xf32>
    %78 = tpu.matmul %74, %77, %cst_29 {dimension_numbers = #tpu.dot_dimension_numbers<[1], [0], [0], [1], [0, 0, 1, 1], [], []>} : vector<20x20xf32>, vector<20x512xf32>, vector<20x512xf32> -> vector<20x512xf32>
    %79 = vector.extract_strided_slice %78 {offsets = [0, 0], sizes = [20, 128], strides = [1, 1]} : vector<20x512xf32> to vector<20x128xf32>
    %80 = vector.broadcast %76 : vector<20x1xf32> to vector<20x128xf32>
    %81 = arith.addf %79, %80 : vector<20x128xf32>
    %82 = vector.extract_strided_slice %78 {offsets = [0, 128], sizes = [20, 128], strides = [1, 1]} : vector<20x512xf32> to vector<20x128xf32>
    %83 = vector.extract_strided_slice %78 {offsets = [0, 256], sizes = [20, 128], strides = [1, 1]} : vector<20x512xf32> to vector<20x128xf32>
    %84 = vector.extract_strided_slice %78 {offsets = [0, 384], sizes = [20, 128], strides = [1, 1]} : vector<20x512xf32> to vector<20x128xf32>
    %85 = math.tanh %81 : vector<20x128xf32>
    %86 = arith.mulf %85, %85 : vector<20x128xf32>
    %cst_30 = arith.constant 1.000000e+00 : f32
    %87 = vector.broadcast %cst_30 : f32 to vector<20x128xf32>
    %88 = arith.subf %87, %86 : vector<20x128xf32>
    %89 = arith.mulf %88, %82 : vector<20x128xf32>
    %90 = arith.mulf %88, %83 : vector<20x128xf32>
    %91 = arith.mulf %88, %84 : vector<20x128xf32>
    %cst_31 = arith.constant 2.000000e+00 : f32
    %92 = vector.broadcast %cst_31 : f32 to vector<20x128xf32>
    %93 = arith.mulf %92, %85 : vector<20x128xf32>
    %94 = arith.mulf %93, %88 : vector<20x128xf32>
    %95 = arith.mulf %94, %82 : vector<20x128xf32>
    %96 = arith.mulf %95, %82 : vector<20x128xf32>
    %97 = arith.subf %91, %96 : vector<20x128xf32>
    %c3 = arith.constant 3 : index
    %c0_32 = arith.constant 0 : index
    %c0_33 = arith.constant 0 : index
    %98 = vector.load %arg4[%c3, %c0_32, %c0_33] : memref<7x20x20xf32, #tpu.memory_space<vmem>>, vector<1x20x20xf32>
    %99 = vector.shape_cast %98 : vector<1x20x20xf32> to vector<20x20xf32>
    %c3_34 = arith.constant 3 : index
    %c0_35 = arith.constant 0 : index
    %c0_36 = arith.constant 0 : index
    %100 = vector.load %arg5[%c3_34, %c0_35, %c0_36] : memref<7x20x1xf32, #tpu.memory_space<vmem>>, vector<1x20x1xf32>
    %101 = vector.shape_cast %100 : vector<1x20x1xf32> to vector<20x1xf32>
    %102 = tpu.concatenate %85, %89, %90, %97 in 1 : vector<20x128xf32>, vector<20x128xf32>, vector<20x128xf32>, vector<20x128xf32> -> vector<20x512xf32>
    %cst_37 = arith.constant dense<0.000000e+00> : vector<20x512xf32>
    %103 = tpu.matmul %99, %102, %cst_37 {dimension_numbers = #tpu.dot_dimension_numbers<[1], [0], [0], [1], [0, 0, 1, 1], [], []>} : vector<20x20xf32>, vector<20x512xf32>, vector<20x512xf32> -> vector<20x512xf32>
    %104 = vector.extract_strided_slice %103 {offsets = [0, 0], sizes = [20, 128], strides = [1, 1]} : vector<20x512xf32> to vector<20x128xf32>
    %105 = vector.broadcast %101 : vector<20x1xf32> to vector<20x128xf32>
    %106 = arith.addf %104, %105 : vector<20x128xf32>
    %107 = vector.extract_strided_slice %103 {offsets = [0, 128], sizes = [20, 128], strides = [1, 1]} : vector<20x512xf32> to vector<20x128xf32>
    %108 = vector.extract_strided_slice %103 {offsets = [0, 256], sizes = [20, 128], strides = [1, 1]} : vector<20x512xf32> to vector<20x128xf32>
    %109 = vector.extract_strided_slice %103 {offsets = [0, 384], sizes = [20, 128], strides = [1, 1]} : vector<20x512xf32> to vector<20x128xf32>
    %110 = math.tanh %106 : vector<20x128xf32>
    %111 = arith.mulf %110, %110 : vector<20x128xf32>
    %cst_38 = arith.constant 1.000000e+00 : f32
    %112 = vector.broadcast %cst_38 : f32 to vector<20x128xf32>
    %113 = arith.subf %112, %111 : vector<20x128xf32>
    %114 = arith.mulf %113, %107 : vector<20x128xf32>
    %115 = arith.mulf %113, %108 : vector<20x128xf32>
    %116 = arith.mulf %113, %109 : vector<20x128xf32>
    %cst_39 = arith.constant 2.000000e+00 : f32
    %117 = vector.broadcast %cst_39 : f32 to vector<20x128xf32>
    %118 = arith.mulf %117, %110 : vector<20x128xf32>
    %119 = arith.mulf %118, %113 : vector<20x128xf32>
    %120 = arith.mulf %119, %107 : vector<20x128xf32>
    %121 = arith.mulf %120, %107 : vector<20x128xf32>
    %122 = arith.subf %116, %121 : vector<20x128xf32>
    %c4 = arith.constant 4 : index
    %c0_40 = arith.constant 0 : index
    %c0_41 = arith.constant 0 : index
    %123 = vector.load %arg4[%c4, %c0_40, %c0_41] : memref<7x20x20xf32, #tpu.memory_space<vmem>>, vector<1x20x20xf32>
    %124 = vector.shape_cast %123 : vector<1x20x20xf32> to vector<20x20xf32>
    %c4_42 = arith.constant 4 : index
    %c0_43 = arith.constant 0 : index
    %c0_44 = arith.constant 0 : index
    %125 = vector.load %arg5[%c4_42, %c0_43, %c0_44] : memref<7x20x1xf32, #tpu.memory_space<vmem>>, vector<1x20x1xf32>
    %126 = vector.shape_cast %125 : vector<1x20x1xf32> to vector<20x1xf32>
    %127 = tpu.concatenate %110, %114, %115, %122 in 1 : vector<20x128xf32>, vector<20x128xf32>, vector<20x128xf32>, vector<20x128xf32> -> vector<20x512xf32>
    %cst_45 = arith.constant dense<0.000000e+00> : vector<20x512xf32>
    %128 = tpu.matmul %124, %127, %cst_45 {dimension_numbers = #tpu.dot_dimension_numbers<[1], [0], [0], [1], [0, 0, 1, 1], [], []>} : vector<20x20xf32>, vector<20x512xf32>, vector<20x512xf32> -> vector<20x512xf32>
    %129 = vector.extract_strided_slice %128 {offsets = [0, 0], sizes = [20, 128], strides = [1, 1]} : vector<20x512xf32> to vector<20x128xf32>
    %130 = vector.broadcast %126 : vector<20x1xf32> to vector<20x128xf32>
    %131 = arith.addf %129, %130 : vector<20x128xf32>
    %132 = vector.extract_strided_slice %128 {offsets = [0, 128], sizes = [20, 128], strides = [1, 1]} : vector<20x512xf32> to vector<20x128xf32>
    %133 = vector.extract_strided_slice %128 {offsets = [0, 256], sizes = [20, 128], strides = [1, 1]} : vector<20x512xf32> to vector<20x128xf32>
    %134 = vector.extract_strided_slice %128 {offsets = [0, 384], sizes = [20, 128], strides = [1, 1]} : vector<20x512xf32> to vector<20x128xf32>
    %135 = math.tanh %131 : vector<20x128xf32>
    %136 = arith.mulf %135, %135 : vector<20x128xf32>
    %cst_46 = arith.constant 1.000000e+00 : f32
    %137 = vector.broadcast %cst_46 : f32 to vector<20x128xf32>
    %138 = arith.subf %137, %136 : vector<20x128xf32>
    %139 = arith.mulf %138, %132 : vector<20x128xf32>
    %140 = arith.mulf %138, %133 : vector<20x128xf32>
    %141 = arith.mulf %138, %134 : vector<20x128xf32>
    %cst_47 = arith.constant 2.000000e+00 : f32
    %142 = vector.broadcast %cst_47 : f32 to vector<20x128xf32>
    %143 = arith.mulf %142, %135 : vector<20x128xf32>
    %144 = arith.mulf %143, %138 : vector<20x128xf32>
    %145 = arith.mulf %144, %132 : vector<20x128xf32>
    %146 = arith.mulf %145, %132 : vector<20x128xf32>
    %147 = arith.subf %141, %146 : vector<20x128xf32>
    %c5 = arith.constant 5 : index
    %c0_48 = arith.constant 0 : index
    %c0_49 = arith.constant 0 : index
    %148 = vector.load %arg4[%c5, %c0_48, %c0_49] : memref<7x20x20xf32, #tpu.memory_space<vmem>>, vector<1x20x20xf32>
    %149 = vector.shape_cast %148 : vector<1x20x20xf32> to vector<20x20xf32>
    %c5_50 = arith.constant 5 : index
    %c0_51 = arith.constant 0 : index
    %c0_52 = arith.constant 0 : index
    %150 = vector.load %arg5[%c5_50, %c0_51, %c0_52] : memref<7x20x1xf32, #tpu.memory_space<vmem>>, vector<1x20x1xf32>
    %151 = vector.shape_cast %150 : vector<1x20x1xf32> to vector<20x1xf32>
    %152 = tpu.concatenate %135, %139, %140, %147 in 1 : vector<20x128xf32>, vector<20x128xf32>, vector<20x128xf32>, vector<20x128xf32> -> vector<20x512xf32>
    %cst_53 = arith.constant dense<0.000000e+00> : vector<20x512xf32>
    %153 = tpu.matmul %149, %152, %cst_53 {dimension_numbers = #tpu.dot_dimension_numbers<[1], [0], [0], [1], [0, 0, 1, 1], [], []>} : vector<20x20xf32>, vector<20x512xf32>, vector<20x512xf32> -> vector<20x512xf32>
    %154 = vector.extract_strided_slice %153 {offsets = [0, 0], sizes = [20, 128], strides = [1, 1]} : vector<20x512xf32> to vector<20x128xf32>
    %155 = vector.broadcast %151 : vector<20x1xf32> to vector<20x128xf32>
    %156 = arith.addf %154, %155 : vector<20x128xf32>
    %157 = vector.extract_strided_slice %153 {offsets = [0, 128], sizes = [20, 128], strides = [1, 1]} : vector<20x512xf32> to vector<20x128xf32>
    %158 = vector.extract_strided_slice %153 {offsets = [0, 256], sizes = [20, 128], strides = [1, 1]} : vector<20x512xf32> to vector<20x128xf32>
    %159 = vector.extract_strided_slice %153 {offsets = [0, 384], sizes = [20, 128], strides = [1, 1]} : vector<20x512xf32> to vector<20x128xf32>
    %160 = math.tanh %156 : vector<20x128xf32>
    %161 = arith.mulf %160, %160 : vector<20x128xf32>
    %cst_54 = arith.constant 1.000000e+00 : f32
    %162 = vector.broadcast %cst_54 : f32 to vector<20x128xf32>
    %163 = arith.subf %162, %161 : vector<20x128xf32>
    %164 = arith.mulf %163, %157 : vector<20x128xf32>
    %165 = arith.mulf %163, %158 : vector<20x128xf32>
    %166 = arith.mulf %163, %159 : vector<20x128xf32>
    %cst_55 = arith.constant 2.000000e+00 : f32
    %167 = vector.broadcast %cst_55 : f32 to vector<20x128xf32>
    %168 = arith.mulf %167, %160 : vector<20x128xf32>
    %169 = arith.mulf %168, %163 : vector<20x128xf32>
    %170 = arith.mulf %169, %157 : vector<20x128xf32>
    %171 = arith.mulf %170, %157 : vector<20x128xf32>
    %172 = arith.subf %166, %171 : vector<20x128xf32>
    %c6 = arith.constant 6 : index
    %c0_56 = arith.constant 0 : index
    %c0_57 = arith.constant 0 : index
    %173 = vector.load %arg4[%c6, %c0_56, %c0_57] : memref<7x20x20xf32, #tpu.memory_space<vmem>>, vector<1x20x20xf32>
    %174 = vector.shape_cast %173 : vector<1x20x20xf32> to vector<20x20xf32>
    %c6_58 = arith.constant 6 : index
    %c0_59 = arith.constant 0 : index
    %c0_60 = arith.constant 0 : index
    %175 = vector.load %arg5[%c6_58, %c0_59, %c0_60] : memref<7x20x1xf32, #tpu.memory_space<vmem>>, vector<1x20x1xf32>
    %176 = vector.shape_cast %175 : vector<1x20x1xf32> to vector<20x1xf32>
    %177 = tpu.concatenate %160, %164, %165, %172 in 1 : vector<20x128xf32>, vector<20x128xf32>, vector<20x128xf32>, vector<20x128xf32> -> vector<20x512xf32>
    %cst_61 = arith.constant dense<0.000000e+00> : vector<20x512xf32>
    %178 = tpu.matmul %174, %177, %cst_61 {dimension_numbers = #tpu.dot_dimension_numbers<[1], [0], [0], [1], [0, 0, 1, 1], [], []>} : vector<20x20xf32>, vector<20x512xf32>, vector<20x512xf32> -> vector<20x512xf32>
    %179 = vector.extract_strided_slice %178 {offsets = [0, 0], sizes = [20, 128], strides = [1, 1]} : vector<20x512xf32> to vector<20x128xf32>
    %180 = vector.broadcast %176 : vector<20x1xf32> to vector<20x128xf32>
    %181 = arith.addf %179, %180 : vector<20x128xf32>
    %182 = vector.extract_strided_slice %178 {offsets = [0, 128], sizes = [20, 128], strides = [1, 1]} : vector<20x512xf32> to vector<20x128xf32>
    %183 = vector.extract_strided_slice %178 {offsets = [0, 256], sizes = [20, 128], strides = [1, 1]} : vector<20x512xf32> to vector<20x128xf32>
    %184 = vector.extract_strided_slice %178 {offsets = [0, 384], sizes = [20, 128], strides = [1, 1]} : vector<20x512xf32> to vector<20x128xf32>
    %185 = math.tanh %181 : vector<20x128xf32>
    %186 = arith.mulf %185, %185 : vector<20x128xf32>
    %cst_62 = arith.constant 1.000000e+00 : f32
    %187 = vector.broadcast %cst_62 : f32 to vector<20x128xf32>
    %188 = arith.subf %187, %186 : vector<20x128xf32>
    %189 = arith.mulf %188, %182 : vector<20x128xf32>
    %190 = arith.mulf %188, %183 : vector<20x128xf32>
    %191 = arith.mulf %188, %184 : vector<20x128xf32>
    %cst_63 = arith.constant 2.000000e+00 : f32
    %192 = vector.broadcast %cst_63 : f32 to vector<20x128xf32>
    %193 = arith.mulf %192, %185 : vector<20x128xf32>
    %194 = arith.mulf %193, %188 : vector<20x128xf32>
    %195 = arith.mulf %194, %182 : vector<20x128xf32>
    %196 = arith.mulf %195, %182 : vector<20x128xf32>
    %197 = arith.subf %191, %196 : vector<20x128xf32>
    %c0_64 = arith.constant 0 : index
    %c0_65 = arith.constant 0 : index
    %198 = vector.load %arg6[%c0_64, %c0_65] : memref<1x20xf32, #tpu.memory_space<vmem>>, vector<1x20xf32>
    %cst_66 = arith.constant 0.00318309898 : f32
    %199 = vector.broadcast %cst_66 : f32 to vector<20x128xf32>
    %200 = arith.mulf %199, %197 : vector<20x128xf32>
    %201 = arith.subf %190, %200 : vector<20x128xf32>
    %202 = tpu.concatenate %185, %189, %201 in 1 : vector<20x128xf32>, vector<20x128xf32>, vector<20x128xf32> -> vector<20x384xf32>
    %cst_67 = arith.constant dense<0.000000e+00> : vector<1x384xf32>
    %203 = tpu.matmul %198, %202, %cst_67 {dimension_numbers = #tpu.dot_dimension_numbers<[1], [0], [0], [1], [0, 0, 1, 1], [], []>} : vector<1x20xf32>, vector<20x384xf32>, vector<1x384xf32> -> vector<1x384xf32>
    %204 = vector.extract_strided_slice %203 {offsets = [0, 0], sizes = [1, 128], strides = [1, 1]} : vector<1x384xf32> to vector<1x128xf32>
    %c0_68 = arith.constant 0 : index
    %c0_69 = arith.constant 0 : index
    %205 = vector.load %arg7[%c0_68, %c0_69] : memref<1x1xf32, #tpu.memory_space<vmem>>, vector<1x1xf32>
    %206 = vector.broadcast %205 : vector<1x1xf32> to vector<1x128xf32>
    %207 = arith.addf %204, %206 : vector<1x128xf32>
    %208 = vector.extract_strided_slice %203 {offsets = [0, 128], sizes = [1, 128], strides = [1, 1]} : vector<1x384xf32> to vector<1x128xf32>
    %209 = vector.extract_strided_slice %203 {offsets = [0, 256], sizes = [1, 128], strides = [1, 1]} : vector<1x384xf32> to vector<1x128xf32>
    %210 = arith.mulf %207, %208 : vector<1x128xf32>
    %211 = arith.addf %209, %210 : vector<1x128xf32>
    %c0_70 = arith.constant 0 : index
    %c0_71 = arith.constant 0 : index
    %212 = vector.load %arg8[%c0_70, %c0_71] : memref<1x128xf32, #tpu.memory_space<vmem>>, vector<1x128xf32>
    tpu.vector_store %arg8[%c0_70, %c0_71], %211 {strides = array<i32>} : memref<1x128xf32, #tpu.memory_space<vmem>>, vector<1x128xf32>,
    return
  }
  func.func @transform_0(%arg0: i32) -> (i32, i32) {
    %c0_i32 = arith.constant 0 : i32
    %c0_i32_0 = arith.constant 0 : i32
    return %c0_i32, %arg0 : i32, i32
  }
  func.func @transform_1(%arg0: i32) -> (i32, i32) {
    %c0_i32 = arith.constant 0 : i32
    %c0_i32_0 = arith.constant 0 : i32
    %c0_i32_1 = arith.constant 0 : i32
    return %c0_i32, %c0_i32_0 : i32, i32
  }
  func.func @transform_2(%arg0: i32) -> (i32, i32) {
    %c0_i32 = arith.constant 0 : i32
    %c0_i32_0 = arith.constant 0 : i32
    %c0_i32_1 = arith.constant 0 : i32
    return %c0_i32, %c0_i32_0 : i32, i32
  }
  func.func @transform_3(%arg0: i32) -> (i32, i32, i32) {
    %c0_i32 = arith.constant 0 : i32
    %c0_i32_0 = arith.constant 0 : i32
    %c0_i32_1 = arith.constant 0 : i32
    %c0_i32_2 = arith.constant 0 : i32
    return %c0_i32, %c0_i32_0, %c0_i32_1 : i32, i32, i32
  }
  func.func @transform_4(%arg0: i32) -> (i32, i32, i32) {
    %c0_i32 = arith.constant 0 : i32
    %c0_i32_0 = arith.constant 0 : i32
    %c0_i32_1 = arith.constant 0 : i32
    %c0_i32_2 = arith.constant 0 : i32
    return %c0_i32, %c0_i32_0, %c0_i32_1 : i32, i32, i32
  }
  func.func @transform_5(%arg0: i32) -> (i32, i32) {
    %c0_i32 = arith.constant 0 : i32
    %c0_i32_0 = arith.constant 0 : i32
    %c0_i32_1 = arith.constant 0 : i32
    return %c0_i32, %c0_i32_0 : i32, i32
  }
  func.func @transform_6(%arg0: i32) -> (i32, i32) {
    %c0_i32 = arith.constant 0 : i32
    %c0_i32_0 = arith.constant 0 : i32
    %c0_i32_1 = arith.constant 0 : i32
    return %c0_i32, %c0_i32_0 : i32, i32
  }
  func.func @transform_7(%arg0: i32) -> (i32, i32) {
    %c0_i32 = arith.constant 0 : i32
    %c0_i32_0 = arith.constant 0 : i32
    return %c0_i32, %arg0 : i32, i32
  }
}

</mosaic_0001>

<bundles_post_ra>
// kernel: tpu_custom_call.1
= control target key start
LH: loop header
LB: loop body
LE: loop exit
PB: predicated region body
PF: predicated region fallthrough
CT: control target
= control target key end

     0   :  { %s2562_s0 = inlined_call_operand.vmem [shape: f32[2,256], index: 0, kind: input, shape index: {}]   ;;  %s2563_s1 = inlined_call_operand.vmem [shape: f32[20,2], index: 1, kind: input, shape index: {}]   ;;  %s2564_s2 = inlined_call_operand.vmem [shape: f32[20,1], index: 2, kind: input, shape index: {}]   ;;  %s2565_s3 = inlined_call_operand.vmem [shape: f32[7,20,20], index: 3, kind: input, shape index: {}]   ;;  %s2566_s4 = inlined_call_operand.vmem [shape: f32[7,20,1], index: 4, kind: input, shape index: {}]   ;;  %s2567_s5 = inlined_call_operand.vmem [shape: f32[1,20], index: 5, kind: input, shape index: {}]   ;;  %s2568_s6 = inlined_call_operand.<no memory space> [shape: f32[1,1], index: 6, kind: input, shape index: {}]   ;;  %s2569_s7 = inlined_call_operand.hbm [shape: f32[1,256], index: 7, kind: output, shape index: {}]  }
   0x1   :  { %v12_v0 = vstv %s2568_s6 }
   0x2   :  { %13 = vst [vmem:[#allocation2] sm:$0x1] %v12_v0 }
   0x3   :  { %14 = vsyncpa [#allocation4], 0 }
   0x4   :  { %16 = vsyncpa [#allocation4 + $0x1], 0  ;;  %s2207_s26 = smov 0   ;;  %s2209_s27 = smov 0  }
   0x5   :  { %s2211_s28 = smov 0   ;;  %s2213_s29 = smov 0  }
   0x6 LB: > { %s2228_s6 = sadd.s32 4294967295, %s2160_s29   ;;  %s1834_s30 = sadd.s32 4294967294, %s2160_s29   ;;  %s2160_s29 = sphi %s2213_s29, %s2575_s29   ;;  %s2156_s28 = sphi %s2211_s28, %s2574_s28   ;;  %s2152_s27 = sphi %s2209_s27, %s2573_s27   ;;  %s2148_s26 = sphi %s2207_s26, %s2572_s26  }
   0x7   : > { %s2232_s8 = sadd.s32 1, %s2160_s29   ;;  %s181_s9 = sadd.s32 1, %s2156_s28 }
   0x8   : > { %s178_s10 = ssub.s32 %s2160_s29, %s2232_s8  ;;  %p191_p0 = scmp.ne.s32.totalorder %s2156_s28, %s2152_s27 }
   0x9   : > { %p179_p1 = scmp.eq.s32.totalorder %s178_s10, 0  ;;  %p192_p2 = scmp.eq.s32.totalorder %s2228_s6, 1 }
   0xa   : > { %p197_p3 = scmp.ne.s32.totalorder %s2152_s27, %s2148_s26  ;;  %p198_p4 = scmp.eq.s32.totalorder %s1834_s30, 1 }
   0xb   : > { %s2243_s11 = scalar_select %p179_p1, %s2156_s28, %s181_s9  }
   0xc   : > { %p2245_p5 = por %p192_p2, %p191_p0  ;;  %p2249_p6 = por %p198_p4, %p197_p3 }
   0xd   : > { %p1837_p7 = scmp.ge.s32.totalorder %s2160_s29, 1  ;;  %p241_p8 = scmp.lt.s32.totalorder %s2160_s29, 3 }
   0xf   : > { %p242_p9 = pnand %p1837_p7, %p241_p8 }
  0x10   : > { %p271_p10 = scmp.lt.s32.totalorder (!%p242_p9), %s2228_s6, 1  ;;  %s269_s9 = sand.u32 (!%p242_p9), 1, %s2152_s27  }
  0x11   : > { %245 = sbr.rel (%p242_p9) target bundleno = 1419 (0x58b), region = 48  ;;  %s1775_s15 = scalar_lea.hbm (!%p242_p9), %s2569_s7, %s2228_s6 }
  0x12   : > { %s1779_s18 = sshll.u32 (!%p242_p9), %s1775_s15, 4  ;;  %s2118_s23 = scalar_lea.hbm (!%p242_p9), %s2569_s7, 2  ;;  %s1780_s18 = int_to_ptr.hbm [resolvable:$true] %s1779_s18 }
  0x13   : > { %s2112_s20 = sshra.s32 (!%p242_p9), %s1780_s18, 4  ;;  %s2113_s20 = int_to_ptr.hbm [resolvable:$true] %s2112_s20 }
  0x14   : > { %s2114_s21 = scalar_lea.hbm (!%p242_p9), %s2113_s20, 1  ;;  %p2119_p0 = scmp.lt.s32.totalorder (!%p242_p9), %s2113_s20, %s2569_s7 }
  0x15   : > { %p2115_p11 = scmp.ne.s32.totalorder (!%p242_p9), %s2113_s20, %s2114_s21  ;;  %p2120_p1 = scmp.lt.s32.totalorder (!%p242_p9), %s2118_s23, %s2114_s21 }
  0x16   : > { %v281_v1 = vld [vmem:[%s2564_s2 + $0x10] sm:$0xf]  ;;  %s272_s16 = scalar_select %p271_p10, %s2228_s6, 1  ;;  %v2162_v2 = vmov 0   ;;  %v279_v3 = vld [vmem:[%s2564_s2] sm:$0xff]  ;;  %vm307_vm0 = vcmask 1041408  }
  0x17   : > { %2041 = vset.pattern.permute.xlu0 %v2162_v2  ;;  %2042 = vset.pattern.permute.xlu1 %v2162_v2  ;;  %v277_v4 = vld [vmem:[%s2563_s1 + $0x8] sm:$0xff]  ;;  %v276_v5 = vld [vmem:[%s2563_s1] sm:$0xff]  ;;  %vm297_vm1 = vcmask 15360   ;;  %v278_v6 = vld [vmem:[%s2563_s1 + $0x10] sm:$0xf]  ;;  %v2163_v9 = vmov 1   ;;  %p2116_p12 = pnand %p2115_p11, %p2245_p5  ;;  %p2121_p2 = por %p2120_p1, %p2119_p0 }
  0x18   : > { %294 = vperm.xlu0 %2041, %v281_v1   ;;  %284 = vperm.xlu1 %2042, %v279_v3   ;;  %s1838_s19 = sshll.u32 %s272_s16, 1  ;;  %v280_v8 = vld [vmem:[%s2564_s2 + $0x8] sm:$0xff]  ;;  %v393_v10 = vld [vmem:[%s2566_s4 + $0x10] sm:$0xf]  ;;  %v1862_v12 = vld [vmem:[%s2566_s4 + $0x18] sm:$0xff]  ;;  %vm404_vm2 = vcmask 1043456  }
  0x19   : > { %2043 = vset.pattern.permute.xlu2 %v2162_v2  ;;  %s274_s24 = scalar_lea.vmem %s2562_s0, %s1838_s19  ;;  %v1864_v11 = vld [vmem:[%s2566_s4 + $0x28] sm:$0xf]  ;;  %v391_v13 = vld [vmem:[%s2566_s4] sm:$0xff]  ;;  %v1884_v14 = vld [vmem:[%s2566_s4 + $0x30] sm:$0xff]  ;;  %vm394_vm3 = vcmask 162816   ;;  %s270_s16 = scalar_lea.vmem [#allocation3], %s269_s9 }
  0x1a   : > { %342 = vperm.xlu2 %2043, %v277_v4   ;;  %v275_v7 = vld [vmem:[%s274_s24] sm:$0x3]  ;;  %v392_v15 = vld [vmem:[%s2566_s4 + $0x8] sm:$0xff]  ;;  %v1885_v16 = vld [vmem:[%s2566_s4 + $0x38] sm:$0xff]  ;;  %s1777_s17 = sshll.u32 %s270_s16, 4  ;;  %s1767_s19 = scalar_lea.sflag [#allocation4], %s269_s9  ;;  %s1778_s17 = int_to_ptr.vmem [resolvable:$true] %s1777_s17 }
  0x1b   : > { %1839 = vmatpush.msk.msra.mxu0 %vm307_vm0, %v275_v7  ;;  %1999 = vmatpush.msk.msra.mxu1 %vm307_vm0, %v275_v7  ;;  %v1906_v17 = vld [vmem:[%s2566_s4 + $0x48] sm:$0xff]  ;;  %v1863_v18 = vld [vmem:[%s2566_s4 + $0x20] sm:$0xff]  ;;  %v1907_v20 = vld [vmem:[%s2566_s4 + $0x50] sm:$0xff]  ;;  %p2117_p13 = pneg %p2116_p12 }
  0x1c   : > { %1840 = vmatmul.msk.f32.vlgmr.msra.gmra.mxu0 %vm297_vm1, %v276_v5  ;;  %1842 = vmatmul.msk.f32.vlgmr.msra.gmra.mxu1 %vm297_vm1, %v278_v6  ;;  %v1928_v22 = vld [vmem:[%s2566_s4 + $0x60] sm:$0xff]  ;;  %v1929_v29 = vld [vmem:[%s2566_s4 + $0x68] sm:$0xff]  ;;  %v1950_v31 = vld [vmem:[%s2566_s4 + $0x78] sm:$0xff] }
  0x1d   : > { %v1886_v26 = vld [vmem:[%s2566_s4 + $0x40] sm:$0xf]  ;;  %v1908_v33 = vld [vmem:[%s2566_s4 + $0x58] sm:$0xf]  ;;  %v1972_v48 = vld [vmem:[%s2566_s4 + $0x90] sm:$0xff]  ;;  %p2122_p3 = pnand %p2121_p2, %p2117_p13 }
  0x1e   : > { %v1951_v38 = vld [vmem:[%s2566_s4 + $0x80] sm:$0xff]  ;;  %v1930_v50 = vld [vmem:[%s2566_s4 + $0x70] sm:$0xf]  ;;  %v1973_v58 = vld [vmem:[%s2566_s4 + $0x98] sm:$0xff] }
  0x1f   : > { %v388_v54 = vld [vmem:[%s2565_s3] sm:$0xff] }
  0x20   : > { %289 = vperm.xlu0 %2041, %v280_v8   ;;  %346 = vperm.xlu1 %2042, %v278_v6   ;;  %v389_v8 = vld [vmem:[%s2565_s3 + $0x8] sm:$0xff] }
  0x22   : > { %338 = vperm.xlu2 %2043, %v276_v5  }
  0x24   : > { %1841 = vmatmul.msk.f32.gmra.mxu0 %vm297_vm1, %v277_v4 }
  0x28   : > { %2044 = vset.pattern.permute.xlu0 %v2163_v9  ;;  %2045 = vset.pattern.permute.xlu1 %v2163_v9 }
  0x29   : > { %358 = vperm.xlu0 %2044, %v278_v6   ;;  %354 = vperm.xlu1 %2045, %v277_v4   ;;  %v1952_v6 = vld [vmem:[%s2566_s4 + $0x88] sm:$0xf] }
  0x2a   : > { %2046 = vset.pattern.permute.xlu2 %v2163_v9 }
  0x2b   : > { %350 = vperm.xlu2 %2046, %v276_v5  }
  0x31   : > { %2047 = vset.pattern.permute.xlu1 %v2162_v2  ;;  %2049 = vset.pattern.permute.xlu0 %v2162_v2 }
  0x32   : > { %533 = vperm.xlu1 %2047, %v393_v10   ;;  %523 = vperm.xlu0 %2049, %v391_v13   ;;  %v1974_v10 = vld [vmem:[%s2566_s4 + $0xa0] sm:$0xf] }
  0x33   : > { %2048 = vset.pattern.permute.xlu2 %v2162_v2 }
  0x34   : > { %528 = vperm.xlu2 %2048, %v392_v15  }
  0x3a   : > { %717 = vperm.xlu1 %2047, %v1864_v11   ;;  %896 = vperm.xlu0 %2049, %v1885_v16   ;;  %v390_v11 = vld [vmem:[%s2565_s3 + $0x10] sm:$0xf] }
  0x3c   : > { %712 = vperm.xlu2 %2048, %v1863_v18  }
  0x42   : > { %707 = vperm.xlu1 %2047, %v1862_v12   ;;  %1080 = vperm.xlu0 %2049, %v1907_v20   ;;  %v1755_v12 = vld [vmem:[#allocation2] sm:$0x1] }
  0x44   : > { %901 = vperm.xlu2 %2048, %v1886_v26  }
  0x4a   : > { %891 = vperm.xlu1 %2047, %v1884_v14   ;;  %1264 = vperm.xlu0 %2049, %v1929_v29  }
  0x4c   : > { %1085 = vperm.xlu2 %2048, %v1908_v33  }
  0x52   : > { %1075 = vperm.xlu1 %2047, %v1906_v17   ;;  %1448 = vperm.xlu0 %2049, %v1951_v38  }
  0x54   : > { %1269 = vperm.xlu2 %2048, %v1930_v50  }
  0x5a   : > { %1259 = vperm.xlu1 %2047, %v1928_v22   ;;  %1632 = vperm.xlu0 %2049, %v1973_v58  }
  0x5c   : > { %1453 = vperm.xlu2 %2048, %v1952_v6  }
  0x62   : > { %1443 = vperm.xlu1 %2047, %v1950_v31  }
  0x64   : > { %1637 = vperm.xlu2 %2048, %v1974_v10  }
  0x6a   : > { %1627 = vperm.xlu1 %2047, %v1972_v48  }
  0x6c   : > { %1758 = vperm.xlu2 %2048, %v1755_v12  }
  0x74   : > { %v2311_v23 = vpop.permute.xlu2 %342 }
  0x7c   : > { %v339_v37 = vpop.permute.xlu2 %338 }
  0x85   : > { %v351_v59 = vpop.permute.xlu2 %350 }
  0x8a   : > { %v295_v19 = vpop.permute.xlu0 %294  ;;  %v285_v21 = vpop.permute.xlu1 %284 }
  0x8e   : > { %v529_v16 = vpop.permute.xlu2 %528 }
  0x92   : > { %v290_v30 = vpop.permute.xlu0 %289  ;;  %v347_v39 = vpop.permute.xlu1 %346 }
  0x99   : > { %v328_v24 = vpop.f32.mrf.mxu0  ;;  %v334_v25 = vpop.f32.mrf.mxu1 }
  0x9a   : > { %v329_v27 = vadd.f32 %v328_v24, %v285_v21  ;;  %v335_v28 = vadd.f32 %v334_v25, %v295_v19 }
  0x9b   : > { %v359_v41 = vpop.permute.xlu0 %358  ;;  %v355_v57 = vpop.permute.xlu1 %354 }
  0x9c   : > { %2050 = vtanh.f32 %v329_v27 }
  0x9d   : > { %2052 = vtanh.f32 %v335_v28 }
  0xa1   : > { %v331_v32 = vpop.f32.mrf.mxu0 }
  0xa2   : > { %v2051_v34 = vpop.eup %2050  ;;  %v332_v35 = vadd.f32 %v331_v32, %v290_v30 }
  0xa3   : > { %v2053_v36 = vpop.eup %2052  ;;  %v364_v42 = vmul.f32 %v2051_v34, %v2051_v34  ;;  %v376_v55 = vmul.f32 -2.0, %v2051_v34 }
  0xa4   : > { %2054 = vtanh.f32 %v332_v35  ;;  %v366_v40 = vmul.f32 %v2053_v36, %v2053_v36  ;;  %1843 = vmatpush.msk.msrb.mxu1 %vm404_vm2, %v2053_v36  ;;  %v378_v44 = vmul.f32 -2.0, %v2053_v36  ;;  %v524_v14 = vpop.permute.xlu0 %523 }
  0xa5   : > { %v367_v49 = vsub.f32 1.0, %v364_v42 }
  0xa6   : > { %v369_v43 = vsub.f32 1.0, %v366_v40 }
  0xa7   : > { %v379_v62 = vmul.f32 %v376_v55, %v367_v49  ;;  %v373_v2 = vmul.f32 %v367_v49, %v351_v59  ;;  %v370_v3 = vmul.f32 %v367_v49, %v339_v37 }
  0xa8   : > { %v381_v45 = vmul.f32 %v378_v44, %v369_v43  ;;  %v375_v46 = vmul.f32 %v369_v43, %v359_v41  ;;  %v372_v47 = vmul.f32 %v369_v43, %v347_v39  ;;  %v1859_v44 = vld [vmem:[%s2565_s3 + $0x18] sm:$0xff] }
  0xa9   : > { %v382_v5 = vmul.f32 %v379_v62, %v339_v37  ;;  %v1860_v62 = vld [vmem:[%s2565_s3 + $0x20] sm:$0xff] }
  0xaa   : > { %v2055_v51 = vpop.eup %2054  ;;  %v384_v52 = vmul.f32 %v381_v45, %v347_v39  ;;  %1847 = vmatpush.msk.msra.mxu2 %vm404_vm2, %v372_v47  ;;  %1851 = vmatpush.msk.msra.mxu3 %vm404_vm2, %v375_v46 }
  0xab   : > { %431 = vmatpush.msrb.mxu1 %v2055_v51  ;;  %v365_v53 = vmul.f32 %v2055_v51, %v2055_v51  ;;  %v377_v61 = vmul.f32 -2.0, %v2055_v51  ;;  %v385_v9 = vmul.f32 %v382_v5, %v339_v37 }
  0xac   : > { %v387_v56 = vmul.f32 %v384_v52, %v347_v39 }
  0xad   : > { %432 = vmatpush.msrb.mxu1 %v2051_v34  ;;  %v368_v60 = vsub.f32 1.0, %v365_v53 }
  0xae   : > { %1855 = vmatpush.msk.msrb.mxu0 %vm404_vm2, %v387_v56  ;;  %1844 = vmatmul.msk.f32.vlgmr.msrb.gmra.mxu1 %vm394_vm3, %v388_v54 }
  0xaf   : > { %v374_v63 = vmul.f32 %v368_v60, %v355_v57  ;;  %v371_v0 = vmul.f32 %v368_v60, %v2311_v23  ;;  %v380_v1 = vmul.f32 %v377_v61, %v368_v60 }
  0xb1   : > { %457 = vmatpush.msra.mxu2 %v371_v0  ;;  %483 = vmatpush.msra.mxu3 %v374_v63  ;;  %v383_v4 = vmul.f32 %v380_v1, %v2311_v23 }
  0xb3   : > { %458 = vmatpush.msra.mxu2 %v370_v3  ;;  %484 = vmatpush.msra.mxu3 %v373_v2  ;;  %v386_v7 = vmul.f32 %v383_v4, %v2311_v23  ;;  %v534_v23 = vpop.permute.xlu1 %533  ;;  %v1861_v2 = vld [vmem:[%s2565_s3 + $0x28] sm:$0xf] }
  0xb4   : > { %1848 = vmatmul.msk.f32.vlgmr.msra.gmra.mxu2 %vm394_vm3, %v388_v54  ;;  %1852 = vmatmul.msk.f32.vlgmr.msra.gmra.mxu3 %vm394_vm3, %v388_v54 }
  0xb5   : > { %509 = vmatpush.msrb.mxu0 %v386_v7  ;;  %v713_v7 = vpop.permute.xlu2 %712 }
  0xb6   : > { %1845 = vmatmul.msk.f32.gmra.mxu1 %vm394_vm3, %v389_v8 }
  0xb7   : > { %510 = vmatpush.msrb.mxu0 %v385_v9 }
  0xb8   : > { %1856 = vmatmul.msk.f32.vlgmr.msrb.gmra.mxu0 %vm394_vm3, %v388_v54 }
  0xbb   : > { %v718_v3 = vpop.permute.xlu1 %717 }
  0xbc   : > { %1849 = vmatmul.msk.f32.gmra.mxu2 %vm394_vm3, %v389_v8  ;;  %1853 = vmatmul.msk.f32.gmra.mxu3 %vm394_vm3, %v389_v8 }
  0xbe   : > { %1846 = vmatmul.msk.f32.gmra.mxu1 %vm394_vm3, %v390_v11 }
  0xc0   : > { %1857 = vmatmul.msk.f32.gmra.mxu0 %vm394_vm3, %v389_v8 }
  0xc3   : > { %v708_v5 = vpop.permute.xlu1 %707 }
  0xc4   : > { %1850 = vmatmul.msk.f32.gmra.mxu2 %vm394_vm3, %v390_v11  ;;  %1854 = vmatmul.msk.f32.gmra.mxu3 %vm394_vm3, %v390_v11 }
  0xc8   : > { %1858 = vmatmul.msk.f32.gmra.mxu0 %vm394_vm3, %v390_v11 }
 0x12b   : > { %v434_v13 = vpop.f32.mrf.mxu1 }
 0x12c   : > { %v536_v15 = vadd.f32 %v524_v14, %v434_v13 }
 0x12e   : > { %2056 = vtanh.f32 %v536_v15 }
 0x133   : > { %v437_v17 = vpop.f32.mrf.mxu1 }
 0x134   : > { %v537_v18 = vadd.f32 %v529_v16, %v437_v17  ;;  %v2057_v22 = vpop.eup %2056 }
 0x135   : > { %v512_v19 = vpop.f32.mrf.mxu0  ;;  %v542_v28 = vmul.f32 %v2057_v22, %v2057_v22  ;;  %v557_v36 = vmul.f32 2.0, %v2057_v22 }
 0x136   : > { %2058 = vtanh.f32 %v537_v18 }
 0x137   : > { %v460_v20 = vpop.f32.mrf.mxu2  ;;  %v486_v21 = vpop.f32.mrf.mxu3  ;;  %v545_v33 = vsub.f32 1.0, %v542_v28 }
 0x139   : > { %v560_v39 = vmul.f32 %v557_v36, %v545_v33  ;;  %v551_v54 = vmul.f32 %v545_v33, %v486_v21  ;;  %v548_v55 = vmul.f32 %v545_v33, %v460_v20  ;;  %v554_v63 = vmul.f32 %v545_v33, %v512_v19 }
 0x13b   : > { %v440_v24 = vpop.f32.mrf.mxu1  ;;  %v563_v49 = vmul.f32 %v560_v39, %v460_v20 }
 0x13c   : > { %v2059_v25 = vpop.eup %2058  ;;  %v538_v26 = vadd.f32 %v534_v23, %v440_v24 }
 0x13d   : > { %v543_v27 = vmul.f32 %v2059_v25, %v2059_v25  ;;  %v515_v31 = vpop.f32.mrf.mxu0  ;;  %v558_v34 = vmul.f32 2.0, %v2059_v25  ;;  %v566_v59 = vmul.f32 %v563_v49, %v460_v20 }
 0x13e   : > { %2060 = vtanh.f32 %v538_v26 }
 0x13f   : > { %v463_v29 = vpop.f32.mrf.mxu2  ;;  %v489_v30 = vpop.f32.mrf.mxu3  ;;  %v546_v32 = vsub.f32 1.0, %v543_v27  ;;  %v569_v1 = vsub.f32 %v554_v63, %v566_v59 }
 0x141   : > { %v561_v37 = vmul.f32 %v558_v34, %v546_v32  ;;  %v552_v51 = vmul.f32 %v546_v32, %v489_v30  ;;  %v549_v53 = vmul.f32 %v546_v32, %v463_v29  ;;  %v555_v60 = vmul.f32 %v546_v32, %v515_v31  ;;  %v1881_v34 = vld [vmem:[%s2565_s3 + $0x30] sm:$0xff] }
 0x143   : > { %v564_v45 = vmul.f32 %v561_v37, %v463_v29 }
 0x144   : > { %v2061_v35 = vpop.eup %2060 }
 0x145   : > { %1865 = vmatpush.msk.msra.mxu1 %vm404_vm2, %v2061_v35  ;;  %v544_v38 = vmul.f32 %v2061_v35, %v2061_v35  ;;  %v559_v42 = vmul.f32 2.0, %v2061_v35  ;;  %v518_v50 = vpop.f32.mrf.mxu0  ;;  %v567_v56 = vmul.f32 %v564_v45, %v463_v29 }
 0x147   : > { %615 = vmatpush.msra.mxu1 %v2059_v25  ;;  %v466_v40 = vpop.f32.mrf.mxu2  ;;  %v547_v41 = vsub.f32 1.0, %v544_v38  ;;  %v492_v43 = vpop.f32.mrf.mxu3  ;;  %v570_v0 = vsub.f32 %v555_v60, %v567_v56  ;;  %v1883_v56 = vld [vmem:[%s2565_s3 + $0x40] sm:$0xf] }
 0x148   : > { %v897_v60 = vpop.permute.xlu0 %896 }
 0x149   : > { %v550_v46 = vmul.f32 %v547_v41, %v466_v40  ;;  %v562_v47 = vmul.f32 %v559_v42, %v547_v41  ;;  %v553_v48 = vmul.f32 %v547_v41, %v492_v43  ;;  %616 = vmatpush.msra.mxu1 %v2057_v22  ;;  %v556_v58 = vmul.f32 %v547_v41, %v518_v50 }
 0x14a   : > { %1866 = vmatmul.msk.f32.vlgmr.msra.gmra.mxu1 %vm394_vm3, %v1859_v44 }
 0x14b   : > { %v565_v52 = vmul.f32 %v562_v47, %v466_v40  ;;  %1869 = vmatpush.msk.msrb.mxu2 %vm404_vm2, %v550_v46  ;;  %1873 = vmatpush.msk.msrb.mxu3 %vm404_vm2, %v553_v48 }
 0x14d   : > { %v568_v57 = vmul.f32 %v565_v52, %v466_v40  ;;  %641 = vmatpush.msrb.mxu2 %v549_v53  ;;  %667 = vmatpush.msrb.mxu3 %v552_v51  ;;  %v1882_v52 = vld [vmem:[%s2565_s3 + $0x38] sm:$0xff] }
 0x14f   : > { %v571_v61 = vsub.f32 %v556_v58, %v568_v57  ;;  %642 = vmatpush.msrb.mxu2 %v548_v55  ;;  %668 = vmatpush.msrb.mxu3 %v551_v54  ;;  %v892_v58 = vpop.permute.xlu1 %891 }
 0x150   : > { %1870 = vmatmul.msk.f32.vlgmr.msrb.gmra.mxu2 %vm394_vm3, %v1859_v44  ;;  %1874 = vmatmul.msk.f32.vlgmr.msrb.gmra.mxu3 %vm394_vm3, %v1859_v44 }
 0x151   : > { %1877 = vmatpush.msk.msra.mxu0 %vm404_vm2, %v571_v61 }
 0x152   : > { %1867 = vmatmul.msk.f32.gmra.mxu1 %vm394_vm3, %v1860_v62 }
 0x153   : > { %693 = vmatpush.msra.mxu0 %v570_v0 }
 0x155   : > { %694 = vmatpush.msra.mxu0 %v569_v1 }
 0x156   : > { %1878 = vmatmul.msk.f32.vlgmr.msra.gmra.mxu0 %vm394_vm3, %v1859_v44 }
 0x158   : > { %1871 = vmatmul.msk.f32.gmra.mxu2 %vm394_vm3, %v1860_v62  ;;  %1875 = vmatmul.msk.f32.gmra.mxu3 %vm394_vm3, %v1860_v62 }
 0x15a   : > { %1868 = vmatmul.msk.f32.gmra.mxu1 %vm394_vm3, %v1861_v2 }
 0x15e   : > { %1879 = vmatmul.msk.f32.gmra.mxu0 %vm394_vm3, %v1860_v62 }
 0x160   : > { %1872 = vmatmul.msk.f32.gmra.mxu2 %vm394_vm3, %v1861_v2  ;;  %1876 = vmatmul.msk.f32.gmra.mxu3 %vm394_vm3, %v1861_v2 }
 0x166   : > { %1880 = vmatmul.msk.f32.gmra.mxu0 %vm394_vm3, %v1861_v2 }
 0x1c7   : > { %v618_v4 = vpop.f32.mrf.mxu1 }
 0x1c8   : > { %v720_v6 = vadd.f32 %v708_v5, %v618_v4 }
 0x1ca   : > { %2062 = vtanh.f32 %v720_v6 }
 0x1cf   : > { %v621_v8 = vpop.f32.mrf.mxu1 }
 0x1d0   : > { %v721_v9 = vadd.f32 %v713_v7, %v621_v8  ;;  %v2063_v13 = vpop.eup %2062 }
 0x1d1   : > { %v726_v18 = vmul.f32 %v2063_v13, %v2063_v13  ;;  %v741_v26 = vmul.f32 2.0, %v2063_v13 }
 0x1d2   : > { %2064 = vtanh.f32 %v721_v9 }
 0x1d3   : > { %v644_v10 = vpop.f32.mrf.mxu2  ;;  %v670_v11 = vpop.f32.mrf.mxu3  ;;  %v729_v23 = vsub.f32 1.0, %v726_v18 }
 0x1d4   : > { %v696_v12 = vpop.f32.mrf.mxu0 }
 0x1d5   : > { %v744_v29 = vmul.f32 %v741_v26, %v729_v23  ;;  %v732_v44 = vmul.f32 %v729_v23, %v644_v10  ;;  %v735_v45 = vmul.f32 %v729_v23, %v670_v11  ;;  %v738_v53 = vmul.f32 %v729_v23, %v696_v12 }
 0x1d7   : > { %v624_v14 = vpop.f32.mrf.mxu1  ;;  %v747_v39 = vmul.f32 %v744_v29, %v644_v10 }
 0x1d8   : > { %v2065_v15 = vpop.eup %2064  ;;  %v722_v16 = vadd.f32 %v718_v3, %v624_v14  ;;  %v902_v3 = vpop.permute.xlu2 %901 }
 0x1d9   : > { %v727_v17 = vmul.f32 %v2065_v15, %v2065_v15  ;;  %v742_v24 = vmul.f32 2.0, %v2065_v15  ;;  %v750_v49 = vmul.f32 %v747_v39, %v644_v10 }
 0x1da   : > { %2066 = vtanh.f32 %v722_v16 }
 0x1db   : > { %v647_v19 = vpop.f32.mrf.mxu2  ;;  %v673_v20 = vpop.f32.mrf.mxu3  ;;  %v730_v22 = vsub.f32 1.0, %v727_v17  ;;  %v753_v55 = vsub.f32 %v738_v53, %v750_v49 }
 0x1dc   : > { %v699_v21 = vpop.f32.mrf.mxu0 }
 0x1dd   : > { %v745_v27 = vmul.f32 %v742_v24, %v730_v22  ;;  %v733_v41 = vmul.f32 %v730_v22, %v647_v19  ;;  %v736_v42 = vmul.f32 %v730_v22, %v673_v20  ;;  %v739_v50 = vmul.f32 %v730_v22, %v699_v21  ;;  %v1903_v24 = vld [vmem:[%s2565_s3 + $0x48] sm:$0xff] }
 0x1df   : > { %v748_v35 = vmul.f32 %v745_v27, %v647_v19 }
 0x1e0   : > { %v2067_v25 = vpop.eup %2066 }
 0x1e1   : > { %1887 = vmatpush.msk.msrb.mxu1 %vm404_vm2, %v2067_v25  ;;  %v728_v28 = vmul.f32 %v2067_v25, %v2067_v25  ;;  %v743_v32 = vmul.f32 2.0, %v2067_v25  ;;  %v751_v46 = vmul.f32 %v748_v35, %v647_v19 }
 0x1e3   : > { %799 = vmatpush.msrb.mxu1 %v2065_v15  ;;  %v650_v30 = vpop.f32.mrf.mxu2  ;;  %v731_v31 = vsub.f32 1.0, %v728_v28  ;;  %v676_v33 = vpop.f32.mrf.mxu3  ;;  %v754_v54 = vsub.f32 %v739_v50, %v751_v46  ;;  %v1905_v46 = vld [vmem:[%s2565_s3 + $0x58] sm:$0xf] }
 0x1e4   : > { %v702_v40 = vpop.f32.mrf.mxu0  ;;  %v1081_v50 = vpop.permute.xlu0 %1080 }
 0x1e5   : > { %v734_v36 = vmul.f32 %v731_v31, %v650_v30  ;;  %v746_v37 = vmul.f32 %v743_v32, %v731_v31  ;;  %v737_v38 = vmul.f32 %v731_v31, %v676_v33  ;;  %800 = vmatpush.msrb.mxu1 %v2063_v13  ;;  %v740_v48 = vmul.f32 %v731_v31, %v702_v40 }
 0x1e6   : > { %1888 = vmatmul.msk.f32.vlgmr.msrb.gmra.mxu1 %vm394_vm3, %v1881_v34 }
 0x1e7   : > { %v749_v43 = vmul.f32 %v746_v37, %v650_v30  ;;  %1891 = vmatpush.msk.msra.mxu2 %vm404_vm2, %v734_v36  ;;  %1895 = vmatpush.msk.msra.mxu3 %vm404_vm2, %v737_v38 }
 0x1e9   : > { %v752_v47 = vmul.f32 %v749_v43, %v650_v30  ;;  %825 = vmatpush.msra.mxu2 %v733_v41  ;;  %851 = vmatpush.msra.mxu3 %v736_v42  ;;  %v1904_v42 = vld [vmem:[%s2565_s3 + $0x50] sm:$0xff] }
 0x1eb   : > { %v755_v51 = vsub.f32 %v740_v48, %v752_v47  ;;  %826 = vmatpush.msra.mxu2 %v732_v44  ;;  %852 = vmatpush.msra.mxu3 %v735_v45  ;;  %v1076_v48 = vpop.permute.xlu1 %1075 }
 0x1ec   : > { %1892 = vmatmul.msk.f32.vlgmr.msra.gmra.mxu2 %vm394_vm3, %v1881_v34  ;;  %1896 = vmatmul.msk.f32.vlgmr.msra.gmra.mxu3 %vm394_vm3, %v1881_v34 }
 0x1ed   : > { %1899 = vmatpush.msk.msrb.mxu0 %vm404_vm2, %v755_v51 }
 0x1ee   : > { %1889 = vmatmul.msk.f32.gmra.mxu1 %vm394_vm3, %v1882_v52 }
 0x1ef   : > { %877 = vmatpush.msrb.mxu0 %v754_v54 }
 0x1f1   : > { %878 = vmatpush.msrb.mxu0 %v753_v55 }
 0x1f2   : > { %1900 = vmatmul.msk.f32.vlgmr.msrb.gmra.mxu0 %vm394_vm3, %v1881_v34 }
 0x1f4   : > { %1893 = vmatmul.msk.f32.gmra.mxu2 %vm394_vm3, %v1882_v52  ;;  %1897 = vmatmul.msk.f32.gmra.mxu3 %vm394_vm3, %v1882_v52 }
 0x1f6   : > { %1890 = vmatmul.msk.f32.gmra.mxu1 %vm394_vm3, %v1883_v56 }
 0x1fa   : > { %1901 = vmatmul.msk.f32.gmra.mxu0 %vm394_vm3, %v1882_v52 }
 0x1fc   : > { %1894 = vmatmul.msk.f32.gmra.mxu2 %vm394_vm3, %v1883_v56  ;;  %1898 = vmatmul.msk.f32.gmra.mxu3 %vm394_vm3, %v1883_v56 }
 0x202   : > { %1902 = vmatmul.msk.f32.gmra.mxu0 %vm394_vm3, %v1883_v56 }
 0x263   : > { %v802_v57 = vpop.f32.mrf.mxu1 }
 0x264   : > { %v904_v59 = vadd.f32 %v892_v58, %v802_v57  ;;  %v1086_v57 = vpop.permute.xlu2 %1085 }
 0x266   : > { %2068 = vtanh.f32 %v904_v59 }
 0x26b   : > { %v805_v61 = vpop.f32.mrf.mxu1 }
 0x26c   : > { %v905_v62 = vadd.f32 %v897_v60, %v805_v61  ;;  %v2069_v2 = vpop.eup %2068 }
 0x26d   : > { %v910_v8 = vmul.f32 %v2069_v2, %v2069_v2  ;;  %v925_v16 = vmul.f32 2.0, %v2069_v2 }
 0x26e   : > { %2070 = vtanh.f32 %v905_v62 }
 0x26f   : > { %v828_v63 = vpop.f32.mrf.mxu2  ;;  %v854_v0 = vpop.f32.mrf.mxu3  ;;  %v913_v13 = vsub.f32 1.0, %v910_v8 }
 0x270   : > { %v880_v1 = vpop.f32.mrf.mxu0 }
 0x271   : > { %v928_v19 = vmul.f32 %v925_v16, %v913_v13  ;;  %v916_v34 = vmul.f32 %v913_v13, %v828_v63  ;;  %v919_v35 = vmul.f32 %v913_v13, %v854_v0  ;;  %v922_v43 = vmul.f32 %v913_v13, %v880_v1 }
 0x273   : > { %v808_v4 = vpop.f32.mrf.mxu1  ;;  %v931_v29 = vmul.f32 %v928_v19, %v828_v63 }
 0x274   : > { %v2071_v5 = vpop.eup %2070  ;;  %v906_v6 = vadd.f32 %v902_v3, %v808_v4 }
 0x275   : > { %v911_v7 = vmul.f32 %v2071_v5, %v2071_v5  ;;  %v926_v14 = vmul.f32 2.0, %v2071_v5  ;;  %v934_v39 = vmul.f32 %v931_v29, %v828_v63 }
 0x276   : > { %2072 = vtanh.f32 %v906_v6 }
 0x277   : > { %v831_v9 = vpop.f32.mrf.mxu2  ;;  %v857_v10 = vpop.f32.mrf.mxu3  ;;  %v914_v12 = vsub.f32 1.0, %v911_v7  ;;  %v937_v45 = vsub.f32 %v922_v43, %v934_v39 }
 0x278   : > { %v883_v11 = vpop.f32.mrf.mxu0 }
 0x279   : > { %v929_v17 = vmul.f32 %v926_v14, %v914_v12  ;;  %v917_v31 = vmul.f32 %v914_v12, %v831_v9  ;;  %v920_v32 = vmul.f32 %v914_v12, %v857_v10  ;;  %v923_v40 = vmul.f32 %v914_v12, %v883_v11  ;;  %v1925_v14 = vld [vmem:[%s2565_s3 + $0x60] sm:$0xff] }
 0x27b   : > { %v932_v25 = vmul.f32 %v929_v17, %v831_v9 }
 0x27c   : > { %v2073_v15 = vpop.eup %2072 }
 0x27d   : > { %1909 = vmatpush.msk.msra.mxu1 %vm404_vm2, %v2073_v15  ;;  %v912_v18 = vmul.f32 %v2073_v15, %v2073_v15  ;;  %v927_v22 = vmul.f32 2.0, %v2073_v15  ;;  %v935_v36 = vmul.f32 %v932_v25, %v831_v9 }
 0x27f   : > { %983 = vmatpush.msra.mxu1 %v2071_v5  ;;  %v834_v20 = vpop.f32.mrf.mxu2  ;;  %v915_v21 = vsub.f32 1.0, %v912_v18  ;;  %v860_v23 = vpop.f32.mrf.mxu3  ;;  %v938_v44 = vsub.f32 %v923_v40, %v935_v36  ;;  %v1927_v36 = vld [vmem:[%s2565_s3 + $0x70] sm:$0xf] }
 0x280   : > { %v886_v30 = vpop.f32.mrf.mxu0  ;;  %v1265_v40 = vpop.permute.xlu0 %1264 }
 0x281   : > { %v918_v26 = vmul.f32 %v915_v21, %v834_v20  ;;  %v930_v27 = vmul.f32 %v927_v22, %v915_v21  ;;  %v921_v28 = vmul.f32 %v915_v21, %v860_v23  ;;  %984 = vmatpush.msra.mxu1 %v2069_v2  ;;  %v924_v38 = vmul.f32 %v915_v21, %v886_v30 }
 0x282   : > { %1910 = vmatmul.msk.f32.vlgmr.msra.gmra.mxu1 %vm394_vm3, %v1903_v24 }
 0x283   : > { %v933_v33 = vmul.f32 %v930_v27, %v834_v20  ;;  %1913 = vmatpush.msk.msrb.mxu2 %vm404_vm2, %v918_v26  ;;  %1917 = vmatpush.msk.msrb.mxu3 %vm404_vm2, %v921_v28 }
 0x285   : > { %v936_v37 = vmul.f32 %v933_v33, %v834_v20  ;;  %1009 = vmatpush.msrb.mxu2 %v917_v31  ;;  %1035 = vmatpush.msrb.mxu3 %v920_v32  ;;  %v1926_v32 = vld [vmem:[%s2565_s3 + $0x68] sm:$0xff] }
 0x287   : > { %v939_v41 = vsub.f32 %v924_v38, %v936_v37  ;;  %1010 = vmatpush.msrb.mxu2 %v916_v34  ;;  %1036 = vmatpush.msrb.mxu3 %v919_v35  ;;  %v1260_v38 = vpop.permute.xlu1 %1259 }
 0x288   : > { %1914 = vmatmul.msk.f32.vlgmr.msrb.gmra.mxu2 %vm394_vm3, %v1903_v24  ;;  %1918 = vmatmul.msk.f32.vlgmr.msrb.gmra.mxu3 %vm394_vm3, %v1903_v24 }
 0x289   : > { %1921 = vmatpush.msk.msra.mxu0 %vm404_vm2, %v939_v41 }
 0x28a   : > { %1911 = vmatmul.msk.f32.gmra.mxu1 %vm394_vm3, %v1904_v42 }
 0x28b   : > { %1061 = vmatpush.msra.mxu0 %v938_v44 }
 0x28d   : > { %1062 = vmatpush.msra.mxu0 %v937_v45 }
 0x28e   : > { %1922 = vmatmul.msk.f32.vlgmr.msra.gmra.mxu0 %vm394_vm3, %v1903_v24 }
 0x290   : > { %1915 = vmatmul.msk.f32.gmra.mxu2 %vm394_vm3, %v1904_v42  ;;  %1919 = vmatmul.msk.f32.gmra.mxu3 %vm394_vm3, %v1904_v42 }
 0x292   : > { %1912 = vmatmul.msk.f32.gmra.mxu1 %vm394_vm3, %v1905_v46 }
 0x296   : > { %1923 = vmatmul.msk.f32.gmra.mxu0 %vm394_vm3, %v1904_v42 }
 0x298   : > { %1916 = vmatmul.msk.f32.gmra.mxu2 %vm394_vm3, %v1905_v46  ;;  %1920 = vmatmul.msk.f32.gmra.mxu3 %vm394_vm3, %v1905_v46 }
 0x29e   : > { %1924 = vmatmul.msk.f32.gmra.mxu0 %vm394_vm3, %v1905_v46 }
 0x2ff   : > { %v986_v47 = vpop.f32.mrf.mxu1 }
 0x300   : > { %v1088_v49 = vadd.f32 %v1076_v48, %v986_v47  ;;  %v1270_v47 = vpop.permute.xlu2 %1269 }
 0x302   : > { %2074 = vtanh.f32 %v1088_v49 }
 0x307   : > { %v989_v51 = vpop.f32.mrf.mxu1 }
 0x308   : > { %v1089_v52 = vadd.f32 %v1081_v50, %v989_v51  ;;  %v2075_v56 = vpop.eup %2074 }
 0x309   : > { %v1094_v62 = vmul.f32 %v2075_v56, %v2075_v56  ;;  %v1109_v6 = vmul.f32 2.0, %v2075_v56 }
 0x30a   : > { %2076 = vtanh.f32 %v1089_v52 }
 0x30b   : > { %v1012_v53 = vpop.f32.mrf.mxu2  ;;  %v1038_v54 = vpop.f32.mrf.mxu3  ;;  %v1097_v3 = vsub.f32 1.0, %v1094_v62 }
 0x30c   : > { %v1064_v55 = vpop.f32.mrf.mxu0 }
 0x30d   : > { %v1112_v9 = vmul.f32 %v1109_v6, %v1097_v3  ;;  %v1100_v24 = vmul.f32 %v1097_v3, %v1012_v53  ;;  %v1103_v25 = vmul.f32 %v1097_v3, %v1038_v54  ;;  %v1106_v33 = vmul.f32 %v1097_v3, %v1064_v55 }
 0x30f   : > { %v992_v58 = vpop.f32.mrf.mxu1  ;;  %v1115_v19 = vmul.f32 %v1112_v9, %v1012_v53 }
 0x310   : > { %v2077_v59 = vpop.eup %2076  ;;  %v1090_v60 = vadd.f32 %v1086_v57, %v992_v58 }
 0x311   : > { %v1095_v61 = vmul.f32 %v2077_v59, %v2077_v59  ;;  %v1110_v4 = vmul.f32 2.0, %v2077_v59  ;;  %v1118_v29 = vmul.f32 %v1115_v19, %v1012_v53 }
 0x312   : > { %2078 = vtanh.f32 %v1090_v60 }
 0x313   : > { %v1015_v63 = vpop.f32.mrf.mxu2  ;;  %v1041_v0 = vpop.f32.mrf.mxu3  ;;  %v1098_v2 = vsub.f32 1.0, %v1095_v61  ;;  %v1121_v35 = vsub.f32 %v1106_v33, %v1118_v29 }
 0x314   : > { %v1067_v1 = vpop.f32.mrf.mxu0 }
 0x315   : > { %v1113_v7 = vmul.f32 %v1110_v4, %v1098_v2  ;;  %v1101_v21 = vmul.f32 %v1098_v2, %v1015_v63  ;;  %v1104_v22 = vmul.f32 %v1098_v2, %v1041_v0  ;;  %v1107_v30 = vmul.f32 %v1098_v2, %v1067_v1  ;;  %v1947_v4 = vld [vmem:[%s2565_s3 + $0x78] sm:$0xff] }
 0x317   : > { %v1116_v15 = vmul.f32 %v1113_v7, %v1015_v63 }
 0x318   : > { %v2079_v5 = vpop.eup %2078 }
 0x319   : > { %1931 = vmatpush.msk.msrb.mxu1 %vm404_vm2, %v2079_v5  ;;  %v1096_v8 = vmul.f32 %v2079_v5, %v2079_v5  ;;  %v1111_v12 = vmul.f32 2.0, %v2079_v5  ;;  %v1119_v26 = vmul.f32 %v1116_v15, %v1015_v63 }
 0x31b   : > { %1167 = vmatpush.msrb.mxu1 %v2077_v59  ;;  %v1018_v10 = vpop.f32.mrf.mxu2  ;;  %v1099_v11 = vsub.f32 1.0, %v1096_v8  ;;  %v1044_v13 = vpop.f32.mrf.mxu3  ;;  %v1122_v34 = vsub.f32 %v1107_v30, %v1119_v26  ;;  %v1949_v26 = vld [vmem:[%s2565_s3 + $0x88] sm:$0xf] }
 0x31c   : > { %v1070_v20 = vpop.f32.mrf.mxu0  ;;  %v1449_v30 = vpop.permute.xlu0 %1448 }
 0x31d   : > { %v1102_v16 = vmul.f32 %v1099_v11, %v1018_v10  ;;  %v1114_v17 = vmul.f32 %v1111_v12, %v1099_v11  ;;  %v1105_v18 = vmul.f32 %v1099_v11, %v1044_v13  ;;  %1168 = vmatpush.msrb.mxu1 %v2075_v56  ;;  %v1108_v28 = vmul.f32 %v1099_v11, %v1070_v20 }
 0x31e   : > { %1932 = vmatmul.msk.f32.vlgmr.msrb.gmra.mxu1 %vm394_vm3, %v1925_v14 }
 0x31f   : > { %v1117_v23 = vmul.f32 %v1114_v17, %v1018_v10  ;;  %1935 = vmatpush.msk.msra.mxu2 %vm404_vm2, %v1102_v16  ;;  %1939 = vmatpush.msk.msra.mxu3 %vm404_vm2, %v1105_v18 }
 0x321   : > { %v1120_v27 = vmul.f32 %v1117_v23, %v1018_v10  ;;  %1193 = vmatpush.msra.mxu2 %v1101_v21  ;;  %1219 = vmatpush.msra.mxu3 %v1104_v22  ;;  %v1948_v22 = vld [vmem:[%s2565_s3 + $0x80] sm:$0xff] }
 0x323   : > { %v1123_v31 = vsub.f32 %v1108_v28, %v1120_v27  ;;  %1194 = vmatpush.msra.mxu2 %v1100_v24  ;;  %1220 = vmatpush.msra.mxu3 %v1103_v25  ;;  %v1444_v28 = vpop.permute.xlu1 %1443 }
 0x324   : > { %1936 = vmatmul.msk.f32.vlgmr.msra.gmra.mxu2 %vm394_vm3, %v1925_v14  ;;  %1940 = vmatmul.msk.f32.vlgmr.msra.gmra.mxu3 %vm394_vm3, %v1925_v14 }
 0x325   : > { %1943 = vmatpush.msk.msrb.mxu0 %vm404_vm2, %v1123_v31 }
 0x326   : > { %1933 = vmatmul.msk.f32.gmra.mxu1 %vm394_vm3, %v1926_v32 }
 0x327   : > { %1245 = vmatpush.msrb.mxu0 %v1122_v34 }
 0x329   : > { %1246 = vmatpush.msrb.mxu0 %v1121_v35 }
 0x32a   : > { %1944 = vmatmul.msk.f32.vlgmr.msrb.gmra.mxu0 %vm394_vm3, %v1925_v14 }
 0x32c   : > { %1937 = vmatmul.msk.f32.gmra.mxu2 %vm394_vm3, %v1926_v32  ;;  %1941 = vmatmul.msk.f32.gmra.mxu3 %vm394_vm3, %v1926_v32 }
 0x32e   : > { %1934 = vmatmul.msk.f32.gmra.mxu1 %vm394_vm3, %v1927_v36 }
 0x332   : > { %1945 = vmatmul.msk.f32.gmra.mxu0 %vm394_vm3, %v1926_v32 }
 0x334   : > { %1938 = vmatmul.msk.f32.gmra.mxu2 %vm394_vm3, %v1927_v36  ;;  %1942 = vmatmul.msk.f32.gmra.mxu3 %vm394_vm3, %v1927_v36 }
 0x33a   : > { %1946 = vmatmul.msk.f32.gmra.mxu0 %vm394_vm3, %v1927_v36 }
 0x39b   : > { %v1170_v37 = vpop.f32.mrf.mxu1 }
 0x39c   : > { %v1272_v39 = vadd.f32 %v1260_v38, %v1170_v37  ;;  %v1454_v37 = vpop.permute.xlu2 %1453 }
 0x39e   : > { %2080 = vtanh.f32 %v1272_v39 }
 0x3a3   : > { %v1173_v41 = vpop.f32.mrf.mxu1 }
 0x3a4   : > { %v1273_v42 = vadd.f32 %v1265_v40, %v1173_v41  ;;  %v2081_v46 = vpop.eup %2080 }
 0x3a5   : > { %v1278_v52 = vmul.f32 %v2081_v46, %v2081_v46  ;;  %v1293_v60 = vmul.f32 2.0, %v2081_v46 }
 0x3a6   : > { %2082 = vtanh.f32 %v1273_v42 }
 0x3a7   : > { %v1196_v43 = vpop.f32.mrf.mxu2  ;;  %v1222_v44 = vpop.f32.mrf.mxu3  ;;  %v1281_v57 = vsub.f32 1.0, %v1278_v52 }
 0x3a8   : > { %v1248_v45 = vpop.f32.mrf.mxu0 }
 0x3a9   : > { %v1296_v63 = vmul.f32 %v1293_v60, %v1281_v57  ;;  %v1284_v14 = vmul.f32 %v1281_v57, %v1196_v43  ;;  %v1287_v15 = vmul.f32 %v1281_v57, %v1222_v44  ;;  %v1290_v23 = vmul.f32 %v1281_v57, %v1248_v45 }
 0x3ab   : > { %v1176_v48 = vpop.f32.mrf.mxu1  ;;  %v1299_v9 = vmul.f32 %v1296_v63, %v1196_v43 }
 0x3ac   : > { %v2083_v49 = vpop.eup %2082  ;;  %v1274_v50 = vadd.f32 %v1270_v47, %v1176_v48 }
 0x3ad   : > { %v1279_v51 = vmul.f32 %v2083_v49, %v2083_v49  ;;  %v1294_v58 = vmul.f32 2.0, %v2083_v49  ;;  %v1302_v19 = vmul.f32 %v1299_v9, %v1196_v43 }
 0x3ae   : > { %2084 = vtanh.f32 %v1274_v50 }
 0x3af   : > { %v1199_v53 = vpop.f32.mrf.mxu2  ;;  %v1225_v54 = vpop.f32.mrf.mxu3  ;;  %v1282_v56 = vsub.f32 1.0, %v1279_v51  ;;  %v1305_v25 = vsub.f32 %v1290_v23, %v1302_v19 }
 0x3b0   : > { %v1251_v55 = vpop.f32.mrf.mxu0 }
 0x3b1   : > { %v1297_v61 = vmul.f32 %v1294_v58, %v1282_v56  ;;  %v1285_v11 = vmul.f32 %v1282_v56, %v1199_v53  ;;  %v1288_v12 = vmul.f32 %v1282_v56, %v1225_v54  ;;  %v1291_v20 = vmul.f32 %v1282_v56, %v1251_v55  ;;  %v1969_v58 = vld [vmem:[%s2565_s3 + $0x90] sm:$0xff] }
 0x3b3   : > { %v1300_v5 = vmul.f32 %v1297_v61, %v1199_v53 }
 0x3b4   : > { %v2085_v59 = vpop.eup %2084 }
 0x3b5   : > { %1953 = vmatpush.msk.msra.mxu1 %vm404_vm2, %v2085_v59  ;;  %v1280_v62 = vmul.f32 %v2085_v59, %v2085_v59  ;;  %v1295_v2 = vmul.f32 2.0, %v2085_v59  ;;  %v1303_v16 = vmul.f32 %v1300_v5, %v1199_v53 }
 0x3b7   : > { %1351 = vmatpush.msra.mxu1 %v2083_v49  ;;  %v1202_v0 = vpop.f32.mrf.mxu2  ;;  %v1283_v1 = vsub.f32 1.0, %v1280_v62  ;;  %v1228_v3 = vpop.f32.mrf.mxu3  ;;  %v1306_v24 = vsub.f32 %v1291_v20, %v1303_v16  ;;  %v1971_v16 = vld [vmem:[%s2565_s3 + $0xa0] sm:$0xf] }
 0x3b8   : > { %v1254_v10 = vpop.f32.mrf.mxu0  ;;  %v1633_v20 = vpop.permute.xlu0 %1632 }
 0x3b9   : > { %v1286_v6 = vmul.f32 %v1283_v1, %v1202_v0  ;;  %v1298_v7 = vmul.f32 %v1295_v2, %v1283_v1  ;;  %v1289_v8 = vmul.f32 %v1283_v1, %v1228_v3  ;;  %1352 = vmatpush.msra.mxu1 %v2081_v46  ;;  %v1292_v18 = vmul.f32 %v1283_v1, %v1254_v10 }
 0x3ba   : > { %1954 = vmatmul.msk.f32.vlgmr.msra.gmra.mxu1 %vm394_vm3, %v1947_v4 }
 0x3bb   : > { %v1301_v13 = vmul.f32 %v1298_v7, %v1202_v0  ;;  %1957 = vmatpush.msk.msrb.mxu2 %vm404_vm2, %v1286_v6  ;;  %1961 = vmatpush.msk.msrb.mxu3 %vm404_vm2, %v1289_v8 }
 0x3bd   : > { %v1304_v17 = vmul.f32 %v1301_v13, %v1202_v0  ;;  %1377 = vmatpush.msrb.mxu2 %v1285_v11  ;;  %1403 = vmatpush.msrb.mxu3 %v1288_v12  ;;  %v1970_v12 = vld [vmem:[%s2565_s3 + $0x98] sm:$0xff] }
 0x3bf   : > { %v1307_v21 = vsub.f32 %v1292_v18, %v1304_v17  ;;  %1378 = vmatpush.msrb.mxu2 %v1284_v14  ;;  %1404 = vmatpush.msrb.mxu3 %v1287_v15  ;;  %v1628_v18 = vpop.permute.xlu1 %1627 }
 0x3c0   : > { %1958 = vmatmul.msk.f32.vlgmr.msrb.gmra.mxu2 %vm394_vm3, %v1947_v4  ;;  %1962 = vmatmul.msk.f32.vlgmr.msrb.gmra.mxu3 %vm394_vm3, %v1947_v4 }
 0x3c1   : > { %1965 = vmatpush.msk.msra.mxu0 %vm404_vm2, %v1307_v21 }
 0x3c2   : > { %1955 = vmatmul.msk.f32.gmra.mxu1 %vm394_vm3, %v1948_v22 }
 0x3c3   : > { %1429 = vmatpush.msra.mxu0 %v1306_v24 }
 0x3c5   : > { %1430 = vmatpush.msra.mxu0 %v1305_v25 }
 0x3c6   : > { %1966 = vmatmul.msk.f32.vlgmr.msra.gmra.mxu0 %vm394_vm3, %v1947_v4 }
 0x3c8   : > { %1959 = vmatmul.msk.f32.gmra.mxu2 %vm394_vm3, %v1948_v22  ;;  %1963 = vmatmul.msk.f32.gmra.mxu3 %vm394_vm3, %v1948_v22 }
 0x3ca   : > { %1956 = vmatmul.msk.f32.gmra.mxu1 %vm394_vm3, %v1949_v26 }
 0x3ce   : > { %1967 = vmatmul.msk.f32.gmra.mxu0 %vm394_vm3, %v1948_v22 }
 0x3d0   : > { %1960 = vmatmul.msk.f32.gmra.mxu2 %vm394_vm3, %v1949_v26  ;;  %1964 = vmatmul.msk.f32.gmra.mxu3 %vm394_vm3, %v1949_v26 }
 0x3d6   : > { %1968 = vmatmul.msk.f32.gmra.mxu0 %vm394_vm3, %v1949_v26 }
 0x437   : > { %v1354_v27 = vpop.f32.mrf.mxu1 }
 0x438   : > { %v1456_v29 = vadd.f32 %v1444_v28, %v1354_v27  ;;  %v1638_v27 = vpop.permute.xlu2 %1637 }
 0x43a   : > { %2086 = vtanh.f32 %v1456_v29 }
 0x43f   : > { %v1357_v31 = vpop.f32.mrf.mxu1 }
 0x440   : > { %v1457_v32 = vadd.f32 %v1449_v30, %v1357_v31  ;;  %v2087_v36 = vpop.eup %2086 }
 0x441   : > { %v1462_v42 = vmul.f32 %v2087_v36, %v2087_v36  ;;  %v1477_v50 = vmul.f32 2.0, %v2087_v36 }
 0x442   : > { %2088 = vtanh.f32 %v1457_v32 }
 0x443   : > { %v1380_v33 = vpop.f32.mrf.mxu2  ;;  %v1406_v34 = vpop.f32.mrf.mxu3  ;;  %v1465_v47 = vsub.f32 1.0, %v1462_v42 }
 0x444   : > { %v1432_v35 = vpop.f32.mrf.mxu0 }
 0x445   : > { %v1480_v53 = vmul.f32 %v1477_v50, %v1465_v47  ;;  %v1468_v4 = vmul.f32 %v1465_v47, %v1380_v33  ;;  %v1471_v5 = vmul.f32 %v1465_v47, %v1406_v34  ;;  %v1474_v13 = vmul.f32 %v1465_v47, %v1432_v35 }
 0x447   : > { %v1360_v38 = vpop.f32.mrf.mxu1  ;;  %v1483_v63 = vmul.f32 %v1480_v53, %v1380_v33 }
 0x448   : > { %v2089_v39 = vpop.eup %2088  ;;  %v1458_v40 = vadd.f32 %v1454_v37, %v1360_v38 }
 0x449   : > { %v1463_v41 = vmul.f32 %v2089_v39, %v2089_v39  ;;  %v1478_v48 = vmul.f32 2.0, %v2089_v39  ;;  %v1486_v9 = vmul.f32 %v1483_v63, %v1380_v33 }
 0x44a   : > { %2090 = vtanh.f32 %v1458_v40 }
 0x44b   : > { %v1383_v43 = vpop.f32.mrf.mxu2  ;;  %v1409_v44 = vpop.f32.mrf.mxu3  ;;  %v1466_v46 = vsub.f32 1.0, %v1463_v41  ;;  %v1489_v15 = vsub.f32 %v1474_v13, %v1486_v9 }
 0x44c   : > { %v1435_v45 = vpop.f32.mrf.mxu0 }
 0x44d   : > { %v1481_v51 = vmul.f32 %v1478_v48, %v1466_v46  ;;  %v1469_v1 = vmul.f32 %v1466_v46, %v1383_v43  ;;  %v1472_v2 = vmul.f32 %v1466_v46, %v1409_v44  ;;  %v1475_v10 = vmul.f32 %v1466_v46, %v1435_v45 }
 0x44f   : > { %v1484_v59 = vmul.f32 %v1481_v51, %v1383_v43 }
 0x450   : > { %v2091_v49 = vpop.eup %2090 }
 0x451   : > { %1975 = vmatpush.msk.msrb.mxu1 %vm404_vm2, %v2091_v49  ;;  %v1464_v52 = vmul.f32 %v2091_v49, %v2091_v49  ;;  %v1479_v56 = vmul.f32 2.0, %v2091_v49  ;;  %v1487_v6 = vmul.f32 %v1484_v59, %v1383_v43  ;;  %v1676_v49 = vld [vmem:[%s2567_s5] sm:$0x1] }
 0x453   : > { %1535 = vmatpush.msrb.mxu1 %v2089_v39  ;;  %v1386_v54 = vpop.f32.mrf.mxu2  ;;  %v1467_v55 = vsub.f32 1.0, %v1464_v52  ;;  %v1412_v57 = vpop.f32.mrf.mxu3  ;;  %v1490_v14 = vsub.f32 %v1475_v10, %v1487_v6 }
 0x454   : > { %v1438_v0 = vpop.f32.mrf.mxu0 }
 0x455   : > { %v1470_v60 = vmul.f32 %v1467_v55, %v1386_v54  ;;  %v1482_v61 = vmul.f32 %v1479_v56, %v1467_v55  ;;  %v1473_v62 = vmul.f32 %v1467_v55, %v1412_v57  ;;  %1536 = vmatpush.msrb.mxu1 %v2087_v36  ;;  %v1476_v8 = vmul.f32 %v1467_v55, %v1438_v0 }
 0x456   : > { %1976 = vmatmul.msk.f32.vlgmr.msrb.gmra.mxu1 %vm394_vm3, %v1969_v58 }
 0x457   : > { %v1485_v3 = vmul.f32 %v1482_v61, %v1386_v54  ;;  %1979 = vmatpush.msk.msra.mxu2 %vm404_vm2, %v1470_v60  ;;  %1983 = vmatpush.msk.msra.mxu3 %vm404_vm2, %v1473_v62 }
 0x459   : > { %v1488_v7 = vmul.f32 %v1485_v3, %v1386_v54  ;;  %1561 = vmatpush.msra.mxu2 %v1469_v1  ;;  %1587 = vmatpush.msra.mxu3 %v1472_v2 }
 0x45b   : > { %v1491_v11 = vsub.f32 %v1476_v8, %v1488_v7  ;;  %1562 = vmatpush.msra.mxu2 %v1468_v4  ;;  %1588 = vmatpush.msra.mxu3 %v1471_v5 }
 0x45c   : > { %1980 = vmatmul.msk.f32.vlgmr.msra.gmra.mxu2 %vm394_vm3, %v1969_v58  ;;  %1984 = vmatmul.msk.f32.vlgmr.msra.gmra.mxu3 %vm394_vm3, %v1969_v58 }
 0x45d   : > { %1987 = vmatpush.msk.msrb.mxu0 %vm404_vm2, %v1491_v11  ;;  %v1759_v11 = vpop.permute.xlu2 %1758 }
 0x45e   : > { %1977 = vmatmul.msk.f32.gmra.mxu1 %vm394_vm3, %v1970_v12  ;;  %v1761_v13 = vperm.slane %v1759_v11, 0 }
 0x45f   : > { %1613 = vmatpush.msrb.mxu0 %v1490_v14 }
 0x461   : > { %1614 = vmatpush.msrb.mxu0 %v1489_v15 }
 0x462   : > { %1988 = vmatmul.msk.f32.vlgmr.msrb.gmra.mxu0 %vm394_vm3, %v1969_v58 }
 0x464   : > { %1981 = vmatmul.msk.f32.gmra.mxu2 %vm394_vm3, %v1970_v12  ;;  %1985 = vmatmul.msk.f32.gmra.mxu3 %vm394_vm3, %v1970_v12 }
 0x466   : > { %1978 = vmatmul.msk.f32.gmra.mxu1 %vm394_vm3, %v1971_v16 }
 0x46a   : > { %1989 = vmatmul.msk.f32.gmra.mxu0 %vm394_vm3, %v1970_v12 }
 0x46c   : > { %1982 = vmatmul.msk.f32.gmra.mxu2 %vm394_vm3, %v1971_v16  ;;  %1986 = vmatmul.msk.f32.gmra.mxu3 %vm394_vm3, %v1971_v16 }
 0x472   : > { %1990 = vmatmul.msk.f32.gmra.mxu0 %vm394_vm3, %v1971_v16 }
 0x4d3   : > { %v1538_v17 = vpop.f32.mrf.mxu1 }
 0x4d4   : > { %v1640_v19 = vadd.f32 %v1628_v18, %v1538_v17 }
 0x4d6   : > { %2092 = vtanh.f32 %v1640_v19 }
 0x4db   : > { %v1541_v21 = vpop.f32.mrf.mxu1 }
 0x4dc   : > { %v1641_v22 = vadd.f32 %v1633_v20, %v1541_v21  ;;  %v2093_v24 = vpop.eup %2092 }
 0x4dd   : > { %v1646_v28 = vmul.f32 %v2093_v24, %v2093_v24  ;;  %v1661_v38 = vmul.f32 2.0, %v2093_v24 }
 0x4de   : > { %2094 = vtanh.f32 %v1641_v22 }
 0x4df   : > { %v1564_v23 = vpop.f32.mrf.mxu2  ;;  %v1616_v25 = vpop.f32.mrf.mxu0  ;;  %v1649_v33 = vsub.f32 1.0, %v1646_v28 }
 0x4e0   : > { %v1590_v26 = vpop.f32.mrf.mxu3 }
 0x4e1   : > { %v1664_v40 = vmul.f32 %v1661_v38, %v1649_v33  ;;  %v1652_v58 = vmul.f32 %v1649_v33, %v1564_v23  ;;  %v1658_v59 = vmul.f32 %v1649_v33, %v1616_v25  ;;  %v1655_v8 = vmul.f32 %v1649_v33, %v1590_v26 }
 0x4e3   : > { %v1544_v29 = vpop.f32.mrf.mxu1  ;;  %v1667_v45 = vmul.f32 %v1664_v40, %v1564_v23 }
 0x4e4   : > { %v2095_v30 = vpop.eup %2094  ;;  %v1642_v31 = vadd.f32 %v1638_v27, %v1544_v29 }
 0x4e5   : > { %v1647_v32 = vmul.f32 %v2095_v30, %v2095_v30  ;;  %v1662_v36 = vmul.f32 2.0, %v2095_v30  ;;  %v1670_v54 = vmul.f32 %v1667_v45, %v1564_v23 }
 0x4e6   : > { %2096 = vtanh.f32 %v1642_v31 }
 0x4e7   : > { %v1567_v34 = vpop.f32.mrf.mxu2  ;;  %v1650_v35 = vsub.f32 1.0, %v1647_v32  ;;  %v1619_v37 = vpop.f32.mrf.mxu0  ;;  %v1673_v0 = vsub.f32 %v1658_v59, %v1670_v54 }
 0x4e8   : > { %v1593_v42 = vpop.f32.mrf.mxu3 }
 0x4e9   : > { %v1665_v39 = vmul.f32 %v1662_v36, %v1650_v35  ;;  %v1653_v55 = vmul.f32 %v1650_v35, %v1567_v34  ;;  %v1659_v56 = vmul.f32 %v1650_v35, %v1619_v37  ;;  %v1677_v5 = vmul.f32 0.003183099, %v1673_v0 }
 0x4ea   : > { %v1656_v6 = vmul.f32 %v1650_v35, %v1593_v42 }
 0x4eb   : > { %v1668_v43 = vmul.f32 %v1665_v39, %v1567_v34  ;;  %v1680_v10 = vsub.f32 %v1655_v8, %v1677_v5 }
 0x4ec   : > { %v2097_v41 = vpop.eup %2096 }
 0x4ed   : > { %1991 = vmatpush.msk.msra.mxu1 %vm404_vm2, %v2097_v41  ;;  %v1648_v44 = vmul.f32 %v2097_v41, %v2097_v41  ;;  %v1663_v48 = vmul.f32 2.0, %v2097_v41  ;;  %v1671_v50 = vmul.f32 %v1668_v43, %v1567_v34 }
 0x4ef   : > { %1709 = vmatpush.msra.mxu1 %v2095_v30  ;;  %v1570_v46 = vpop.f32.mrf.mxu2  ;;  %v1651_v47 = vsub.f32 1.0, %v1648_v44  ;;  %v1622_v53 = vpop.f32.mrf.mxu0  ;;  %v1674_v60 = vsub.f32 %v1659_v56, %v1671_v50 }
 0x4f0   : > { %v1596_v63 = vpop.f32.mrf.mxu3 }
 0x4f1   : > { %v1654_v51 = vmul.f32 %v1651_v47, %v1570_v46  ;;  %v1666_v52 = vmul.f32 %v1663_v48, %v1651_v47  ;;  %1710 = vmatpush.msra.mxu1 %v2093_v24  ;;  %v1660_v62 = vmul.f32 %v1651_v47, %v1622_v53  ;;  %v1678_v2 = vmul.f32 0.003183099, %v1674_v60 }
 0x4f2   : > { %1992 = vmatmul.msk.f32.vlgmr.msra.gmra.mxu1 %vm394_vm3, %v1676_v49  ;;  %v1657_v3 = vmul.f32 %v1651_v47, %v1596_v63 }
 0x4f3   : > { %v1669_v57 = vmul.f32 %v1666_v52, %v1570_v46  ;;  %1993 = vmatpush.msk.msrb.mxu2 %vm404_vm2, %v1654_v51  ;;  %v1681_v9 = vsub.f32 %v1656_v6, %v1678_v2 }
 0x4f5   : > { %v1672_v61 = vmul.f32 %v1669_v57, %v1570_v46  ;;  %1729 = vmatpush.msrb.mxu2 %v1653_v55 }
 0x4f7   : > { %v1675_v1 = vsub.f32 %v1660_v62, %v1672_v61  ;;  %1730 = vmatpush.msrb.mxu2 %v1652_v58 }
 0x4f8   : > { %1994 = vmatmul.msk.f32.vlgmr.msrb.gmra.mxu2 %vm394_vm3, %v1676_v49 }
 0x4f9   : > { %v1679_v4 = vmul.f32 0.003183099, %v1675_v1 }
 0x4fb   : > { %v1682_v7 = vsub.f32 %v1657_v3, %v1679_v4 }
 0x4fd   : > { %1995 = vmatpush.msk.msrb.mxu3 %vm404_vm2, %v1682_v7 }
 0x4ff   : > { %1749 = vmatpush.msrb.mxu3 %v1681_v9 }
 0x501   : > { %1750 = vmatpush.msrb.mxu3 %v1680_v10 }
 0x502   : > { %1996 = vmatmul.msk.f32.vlgmr.msrb.gmra.mxu3 %vm394_vm3, %v1676_v49 }
 0x56f   : > { %v1712_v12 = vpop.f32.mrf.mxu1 }
 0x570   : > { %v1762_v15 = vadd.f32 %v1761_v13, %v1712_v12 }
 0x57b   : > { %v1732_v14 = vpop.f32.mrf.mxu2 }
 0x57c   : > { %v1763_v16 = vmul.f32 %v1762_v15, %v1732_v14 }
 0x585   : > { %v1752_v17 = vpop.f32.mrf.mxu3 }
 0x586   : > { %v1764_v18 = vadd.f32 %v1763_v16, %v1752_v17 }
 0x588   : > { %1765 = vst [vmem:[%s270_s16] sm:$0x1] %v1764_v18 }
 0x589   : > { %2125 = shalt.err (!%p2122_p3)
}
 0x58a   : > { %2000 = dma.vmem_to_hbm [thread:$0]  (%p2245_p5), %s1778_s17, 16, %s1780_s18, %s1767_s19  }
 0x58b PF: > { %p2006_p4 = scmp.ge.s32.totalorder %s2160_s29, 2  ;;  %s1791_s30 = sand.u32 1, %s2148_s26  }
 0x58c   : > { %s1792_s9 = scalar_lea.sflag [#allocation4], %s1791_s30 }
 0x58d   : > { %p2003_p7 = pnand %p2006_p4, %p2249_p6 }
 0x58f   : > { %p2004_p8 = pneg %p2003_p7 }
 0x591   : > { %2143 = dma.done.wait (%p2004_p8), %s1792_s9, 16  }
 0x592   : > { %2145 = vsyncadd (%p2004_p8), %s1792_s9, 4294967280  ;;  %p19_p9 = scmp.ge.s32.totalorder %s2232_s8, 4   ;;  %s2572_s26 = smov %s2152_s27 }
 0x593   : > { %s2573_s27 = smov %s2156_s28  ;;  %s2574_s28 = smov %s2243_s11 }
 0x594   : > { %s2575_s29 = smov %s2232_s8  ;;  %21 = sbr.rel (!%p19_p9) target bundleno = 6 (0x6), region = 95 }
 0x599   :  { %1797 = vsyncpa [#allocation4], 1 }
 0x59a   :  { %1799 = vsyncpa [#allocation4 + $0x1], 1 }

</bundles_post_ra>
